<compile_context>
chip_gen: v5e
topology: v5e:2x2
jax: 0.10.0
libtpu: 0.0.40
codegen_flags: <defaults>
</compile_context>

<pallas_src>
import functools

import jax
import jax.numpy as jnp
from jax import lax
from jax.experimental import pallas as pl
from jax.experimental.pallas import tpu as pltpu

F32 = jnp.float32
BF16 = jnp.bfloat16
_VMEM_LIMIT = 32 * 1024 * 1024  # explicit scoped-VMEM budget; safe on v5e/v6e/v7x


# ----------------------------------------------------------------------------- helpers
def _round_up(x, m):
    return ((x + m - 1) // m) * m


def _pad_rows(x, rows):
    pad = rows - x.shape[0]
    return x if pad == 0 else jnp.pad(x, ((0, pad), (0, 0)))


def _pad_2d(x, rows, cols):
    return jnp.pad(x, ((0, rows - x.shape[0]), (0, cols - x.shape[1])))


# ----------------------------------------------------------------------------- matmul
def _matmul_kernel(a_ref, b_ref, o_ref, acc_ref):
    @pl.when(pl.program_id(2) == 0)
    def _():
        acc_ref[...] = jnp.zeros_like(acc_ref)

    acc_ref[...] += jnp.dot(a_ref[...], b_ref[...], preferred_element_type=jnp.float32)

    @pl.when(pl.program_id(2) == pl.num_programs(2) - 1)
    def _():
        o_ref[...] = acc_ref[...]


def pallas_matmul(a, b, *, tm=256, tn=256, tk=256):
    """a (M,K) @ b (K,N) -> (M,N) f32.  bf16 MXU inputs, f32 VMEM accumulator."""
    M, K = a.shape
    K2, N = b.shape
    assert K == K2
    tm = min(tm, _round_up(M, 8))
    tk = min(tk, _round_up(K, 128))
    tn = min(tn, _round_up(N, 128))
    Mp, Kp, Np = _round_up(M, tm), _round_up(K, tk), _round_up(N, tn)
    a_p = _pad_2d(a.astype(F32), Mp, Kp).astype(BF16)
    b_p = _pad_2d(b.astype(F32), Kp, Np).astype(BF16)
    out = pl.pallas_call(
        _matmul_kernel,
        out_shape=jax.ShapeDtypeStruct((Mp, Np), F32),
        grid_spec=pltpu.PrefetchScalarGridSpec(
            num_scalar_prefetch=0,
            grid=(Mp // tm, Np // tn, Kp // tk),
            in_specs=[pl.BlockSpec((tm, tk), lambda i, j, k: (i, k)),
                      pl.BlockSpec((tk, tn), lambda i, j, k: (k, j))],
            out_specs=pl.BlockSpec((tm, tn), lambda i, j, k: (i, j)),
            scratch_shapes=[pltpu.VMEM((tm, tn), jnp.float32)]),
        compiler_params=pltpu.CompilerParams(
            dimension_semantics=("parallel", "parallel", "arbitrary"),
            vmem_limit_bytes=_VMEM_LIMIT),
    )(a_p, b_p)
    return out[:M, :N]


# --------------------------------------------------------------------- edge attention
def _edge_attn_kernel(hi_ref, hj_ref, rel_ref, wsrc_ref, wdst_ref, wrel_ref,
                      slab_ref, *, num_heads, head_dim, alpha):
    H, D = num_heads, head_dim
    # One fused MXU pass for all heads.  Columns [H*D, H*D+H) of the stacked weights
    # hold (a2_h @ a_*_h).T, so the per-head attention logit p_h comes out of the same
    # matmul (no serialized skinny (E,D)x(D,1) matmul).
    m = (jnp.dot(hi_ref[...], wsrc_ref[...], preferred_element_type=jnp.float32)
         + jnp.dot(hj_ref[...], wdst_ref[...], preferred_element_type=jnp.float32)
         + jnp.dot(rel_ref[...], wrel_ref[...], preferred_element_type=jnp.float32))
    te, wslab = m.shape
    ew_parts, e_parts = [], []
    for h in range(H):                                      # tiny static head loop
        p = m[:, H * D + h:H * D + h + 1]                   # (TE, 1) logit of head h
        lr = jnp.where(p > 0, p, alpha * p)                 # LeakyReLU
        e = jnp.exp(-lr)                                    # attention value (matches ref)
        e_parts.append(e)
        ew_parts.append(e * m[:, h * D:(h + 1) * D])        # edge_w of head h
    pieces = ew_parts + e_parts
    pad = wslab - (H * D + H)
    if pad:
        pieces.append(jnp.zeros((te, pad), jnp.float32))
    slab_ref[...] = jnp.concatenate(pieces, axis=1)         # single lane-dense store


def sp_graph_attention_layer(x, edge_all, edge_embed_all, heads, alpha, *, edge_tile=1024):
    """Batched-head SpGraphAttentionLayer message pass.

    Returns the scatter-added node slab (N, Wslab): columns [0, H*D) hold h_prime
    (heads concatenated), columns [H*D, H*D+H) hold the per-head e_rowsum.
    """
    N, d_in = x.shape
    E = edge_all.shape[1]
    d_rel = edge_embed_all.shape[1]
    H = len(heads)
    D = heads[0]["a"].shape[0]
    wslab = _round_up(H * D + H, 128)

    # Stack per-head projections and fold a2 into one extra logit column per head.
    w_src = jnp.zeros((d_in, wslab), F32)
    w_dst = jnp.zeros((d_in, wslab), F32)
    w_rel = jnp.zeros((d_rel, wslab), F32)
    for h, head in enumerate(heads):
        a = head["a"].astype(F32)                            # (D, 2*d_in + d_rel)
        a2 = head["a2"].astype(F32)                          # (1, D)
        a_src, a_dst, a_rel = a[:, :d_in], a[:, d_in:2 * d_in], a[:, 2 * d_in:]
        w_src = w_src.at[:, h * D:(h + 1) * D].set(a_src.T)
        w_dst = w_dst.at[:, h * D:(h + 1) * D].set(a_dst.T)
        w_rel = w_rel.at[:, h * D:(h + 1) * D].set(a_rel.T)
        w_src = w_src.at[:, H * D + h].set((a2 @ a_src)[0])
        w_dst = w_dst.at[:, H * D + h].set((a2 @ a_dst)[0])
        w_rel = w_rel.at[:, H * D + h].set((a2 @ a_rel)[0])

    # Edge-endpoint gathers (data dependent) stay in XLA; edge_h is never concatenated in HBM.
    h_i = jnp.take(x, edge_all[0], axis=0)
    h_j = jnp.take(x, edge_all[1], axis=0)

    te = min(edge_tile, _round_up(E, 8))
    e_pad = _round_up(E, te)
    h_i = _pad_rows(h_i.astype(F32), e_pad).astype(BF16)
    h_j = _pad_rows(h_j.astype(F32), e_pad).astype(BF16)
    rel = _pad_rows(edge_embed_all.astype(F32), e_pad).astype(BF16)

    kernel = functools.partial(_edge_attn_kernel, num_heads=H, head_dim=D, alpha=alpha)
    edge_slab = pl.pallas_call(
        kernel,
        out_shape=jax.ShapeDtypeStruct((e_pad, wslab), F32),
        grid_spec=pltpu.PrefetchScalarGridSpec(
            num_scalar_prefetch=0,
            grid=(e_pad // te,),
            in_specs=[pl.BlockSpec((te, d_in), lambda i: (i, 0)),
                      pl.BlockSpec((te, d_in), lambda i: (i, 0)),
                      pl.BlockSpec((te, d_rel), lambda i: (i, 0)),
                      pl.BlockSpec((d_in, wslab), lambda i: (0, 0)),
                      pl.BlockSpec((d_in, wslab), lambda i: (0, 0)),
                      pl.BlockSpec((d_rel, wslab), lambda i: (0, 0))],
            out_specs=pl.BlockSpec((te, wslab), lambda i: (i, 0))),
        compiler_params=pltpu.CompilerParams(
            dimension_semantics=("parallel",),
            vmem_limit_bytes=_VMEM_LIMIT),
    )(h_i, h_j, rel,
      w_src.astype(BF16), w_dst.astype(BF16), w_rel.astype(BF16))

    edge_slab = edge_slab[:E]
    # TODO(synk): data-dependent scatter-add (SpecialSpmmFinal) kept as XLA segment_sum;
    # a sorted/tiled Pallas accumulate is the next step if this dominates at real E.
    node_slab = jax.ops.segment_sum(edge_slab, edge_all[0], num_segments=N)
    return node_slab, H, D


# ----------------------------------------------------------------------- epilogue kernels
def _finalize_kernel(slab_ref, out_ref, *, num_heads, head_dim, apply_elu):
    H, D = num_heads, head_dim
    slab = slab_ref[...]
    parts = []
    for h in range(H):
        rs = slab[:, H * D + h:H * D + h + 1]
        rs = jnp.where(rs == 0.0, 1e-12, rs)                 # e_rowsum[e_rowsum == 0] = 1e-12
        v = slab[:, h * D:(h + 1) * D] * pl.reciprocal(rs, approx=True)
        if apply_elu:
            # ELU(alpha=1); exp(v)-1 kept (vs expm1) for Mosaic lowering compatibility.
            v = jnp.where(v > 0, v, jnp.exp(v) - 1.0)
        parts.append(v)
    out_ref[...] = jnp.concatenate(parts, axis=1) if len(parts) > 1 else parts[0]


def pallas_attn_finalize(node_slab, num_heads, head_dim, *, apply_elu, node_tile=512):
    N, wslab = node_slab.shape
    d_out = num_heads * head_dim
    tn = min(node_tile, _round_up(N, 8))
    n_pad = _round_up(N, tn)
    kernel = functools.partial(_finalize_kernel, num_heads=num_heads,
                               head_dim=head_dim, apply_elu=apply_elu)
    out = pl.pallas_call(
        kernel,
        out_shape=jax.ShapeDtypeStruct((n_pad, d_out), F32),
        grid_spec=pltpu.PrefetchScalarGridSpec(
            num_scalar_prefetch=0,
            grid=(n_pad // tn,),
            in_specs=[pl.BlockSpec((tn, wslab), lambda i: (i, 0))],
            out_specs=pl.BlockSpec((tn, d_out), lambda i: (i, 0))),
        compiler_params=pltpu.CompilerParams(
            dimension_semantics=("parallel",),
            vmem_limit_bytes=_VMEM_LIMIT),
    )(_pad_rows(node_slab, n_pad))
    return out[:N]


def _finalize_combine_norm_kernel(slab_ref, eu_ref, mask_ref, out_ref, *, num_heads, head_dim):
    H, D = num_heads, head_dim
    slab = slab_ref[...]
    parts = []
    for h in range(H):
        rs = slab[:, H * D + h:H * D + h + 1]
        rs = jnp.where(rs == 0.0, 1e-12, rs)
        v = slab[:, h * D:(h + 1) * D] * pl.reciprocal(rs, approx=True)
        v = jnp.where(v > 0, v, jnp.exp(v) - 1.0)            # outer F.elu
        parts.append(v)
    h_out = jnp.concatenate(parts, axis=1) if len(parts) > 1 else parts[0]
    x = eu_ref[...] + mask_ref[...] * h_out                  # entities_upgraded + mask*out
    ssq = jnp.sum(x * x, axis=1, keepdims=True)
    out_ref[...] = x * lax.rsqrt(jnp.maximum(ssq, 1e-24))    # F.normalize(p=2, dim=1)


def pallas_finalize_combine_normalize(node_slab, entities_upgraded, mask_col,
                                      num_heads, head_dim, *, node_tile=512):
    N, wslab = node_slab.shape
    d_out = entities_upgraded.shape[1]
    tn = min(node_tile, _round_up(N, 8))
    n_pad = _round_up(N, tn)
    kernel = functools.partial(_finalize_combine_norm_kernel,
                               num_heads=num_heads, head_dim=head_dim)
    out = pl.pallas_call(
        kernel,
        out_shape=jax.ShapeDtypeStruct((n_pad, d_out), F32),
        grid_spec=pltpu.PrefetchScalarGridSpec(
            num_scalar_prefetch=0,
            grid=(n_pad // tn,),
            in_specs=[pl.BlockSpec((tn, wslab), lambda i: (i, 0)),
                      pl.BlockSpec((tn, d_out), lambda i: (i, 0)),
                      pl.BlockSpec((tn, 1), lambda i: (i, 0))],
            out_specs=pl.BlockSpec((tn, d_out), lambda i: (i, 0))),
        compiler_params=pltpu.CompilerParams(
            dimension_semantics=("parallel",),
            vmem_limit_bytes=_VMEM_LIMIT),
    )(_pad_rows(node_slab, n_pad),
      _pad_rows(entities_upgraded.astype(F32), n_pad),
      _pad_rows(mask_col.astype(F32), n_pad))
    return out[:N]


def _l2norm_kernel(x_ref, o_ref):
    x = x_ref[...]
    ssq = jnp.sum(x * x, axis=1, keepdims=True)
    o_ref[...] = x * lax.rsqrt(jnp.maximum(ssq, 1e-24))      # F.normalize(p=2, dim=1)


def pallas_l2_normalize(x, *, node_tile=512):
    N, D = x.shape
    tn = min(node_tile, _round_up(N, 8))
    n_pad = _round_up(N, tn)
    out = pl.pallas_call(
        _l2norm_kernel,
        out_shape=jax.ShapeDtypeStruct((n_pad, D), F32),
        grid_spec=pltpu.PrefetchScalarGridSpec(
            num_scalar_prefetch=0,
            grid=(n_pad // tn,),
            in_specs=[pl.BlockSpec((tn, D), lambda i: (i, 0))],
            out_specs=pl.BlockSpec((tn, D), lambda i: (i, 0))),
        compiler_params=pltpu.CompilerParams(
            dimension_semantics=("parallel",),
            vmem_limit_bytes=_VMEM_LIMIT),
    )(_pad_rows(x.astype(F32), n_pad))
    return out[:N]


# ------------------------------------------------------------------------ model glue
def spgat_forward(params, x, relation_embed, edge_list, edge_type, edge_embed,
                  edge_list_nhop, edge_type_nhop, alpha):
    """SpGAT.forward — returns (out_att node slab, (H,D) of out_att, out_relation_1)."""
    edge_embed_nhop = (jnp.take(relation_embed, edge_type_nhop[:, 0], axis=0)
                       + jnp.take(relation_embed, edge_type_nhop[:, 1], axis=0))
    edge_all = jnp.concatenate([edge_list, edge_list_nhop], axis=1)         # (2, Etot)
    rel_all = jnp.concatenate([edge_embed, edge_embed_nhop], axis=0)        # (Etot, nrela)

    # ---- layer 1: all heads batched into one edge-attention kernel (concat=True -> ELU)
    slab1, H1, D1 = sp_graph_attention_layer(x, edge_all, rel_all,
                                             params["attentions"], alpha)
    x1 = pallas_attn_finalize(slab1, H1, D1, apply_elu=True)                # (N, H1*D1)
    # dropout_layer: identity (eval-mode semantics)

    # ---- relation projection
    out_relation_1 = pallas_matmul(relation_embed, params["W"])

    edge_embed_2 = jnp.take(out_relation_1, edge_type, axis=0)
    edge_embed_nhop_2 = (jnp.take(out_relation_1, edge_type_nhop[:, 0], axis=0)
                         + jnp.take(out_relation_1, edge_type_nhop[:, 1], axis=0))
    rel_all_2 = jnp.concatenate([edge_embed_2, edge_embed_nhop_2], axis=0)

    # ---- out_att (concat=False): return its raw node slab; the outer F.elu + rowsum
    #      divide are fused into the final combine/normalize kernel by the caller.
    slab2, H2, D2 = sp_graph_attention_layer(x1, edge_all, rel_all_2,
                                             [params["out_att"]], alpha)
    return slab2, (H2, D2), out_relation_1


def spkbgat_forward(params, adj, batch_inputs, train_indices_nhop, *, alpha):
    edge_list, edge_type = adj
    edge_list_nhop = jnp.stack(
        [train_indices_nhop[:, 3], train_indices_nhop[:, 0]], axis=0)       # (2, E2)
    edge_type_nhop = jnp.stack(
        [train_indices_nhop[:, 1], train_indices_nhop[:, 2]], axis=1)       # (E2, 2)
    edge_embed = jnp.take(params["relation_embeddings"], edge_type, axis=0)

    # self.entity_embeddings.data = F.normalize(..., p=2, dim=1)
    entity_emb = pallas_l2_normalize(params["entity_embeddings"])

    slab2, (H2, D2), out_relation_1 = spgat_forward(
        params["sparse_gat_1"], entity_emb, params["relation_embeddings"],
        edge_list, edge_type, edge_embed, edge_list_nhop, edge_type_nhop, alpha)

    num_nodes = entity_emb.shape[0]
    mask = jnp.zeros((num_nodes,), F32).at[batch_inputs[:, 2]].set(1.0)
    entities_upgraded = pallas_matmul(entity_emb, params["W_entities"])
    out_entity_1 = pallas_finalize_combine_normalize(
        slab2, entities_upgraded, mask[:, None], H2, D2)
    return out_entity_1, out_relation_1


# ------------------------------------------------------------------------ init
def _xavier(key, shape, gain=1.414):
    limit = gain * jnp.sqrt(6.0 / (shape[0] + shape[1]))
    return jax.random.uniform(key, shape, F32, -limit, limit)


def init_params(key, num_nodes, entity_in_dim, num_relation, relation_dim, nhid, nheads):
    keys = jax.random.split(key, 7 + 2 * nheads)
    attentions = []
    for h in range(nheads):
        attentions.append({
            "a": _xavier(keys[2 * h], (nhid, 2 * entity_in_dim + relation_dim)),
            "a2": _xavier(keys[2 * h + 1], (1, nhid)),
        })
    k = 2 * nheads
    out_dim = nhid * nheads
    params = {
        "entity_embeddings": jax.random.normal(keys[k + 0], (num_nodes, entity_in_dim), F32),
        "relation_embeddings": jax.random.normal(keys[k + 1], (num_relation, relation_dim), F32),
        "W_entities": _xavier(keys[k + 2], (entity_in_dim, out_dim)),
        "sparse_gat_1": {
            "attentions": attentions,
            "W": _xavier(keys[k + 3], (relation_dim, out_dim)),
            "out_att": {
                "a": _xavier(keys[k + 4], (out_dim, 2 * out_dim + out_dim)),
                "a2": _xavier(keys[k + 5], (1, out_dim)),
            },
        },
    }
    return params


# ------------------------------------------------------------------------ main
if __name__ == "__main__":
    key = jax.random.PRNGKey(0)
    num_nodes, entity_in_dim = 64, 32
    num_relation, relation_dim = 16, 32
    nhid, nheads = 32, 2          # entity_out_dim[0], nheads_GAT[0]
    alpha = 0.2                   # LeakyReLU slope
    E, E2, B = 40, 24, 10

    pkey, dkey = jax.random.split(key)
    params = init_params(pkey, num_nodes, entity_in_dim, num_relation, relation_dim, nhid, nheads)

    dkeys = jax.random.split(dkey, 7)
    edge_list = jax.random.randint(dkeys[0], (2, E), 0, num_nodes, dtype=jnp.int32)
    edge_type = jax.random.randint(dkeys[1], (E,), 0, num_relation, dtype=jnp.int32)
    # train_indices_nhop columns: [entity1, relation1, relation2, entity2]
    tn_e1 = jax.random.randint(dkeys[2], (E2, 1), 0, num_nodes, dtype=jnp.int32)
    tn_r1 = jax.random.randint(dkeys[3], (E2, 1), 0, num_relation, dtype=jnp.int32)
    tn_r2 = jax.random.randint(dkeys[4], (E2, 1), 0, num_relation, dtype=jnp.int32)
    tn_e2 = jax.random.randint(dkeys[5], (E2, 1), 0, num_nodes, dtype=jnp.int32)
    train_indices_nhop = jnp.concatenate([tn_e1, tn_r1, tn_r2, tn_e2], axis=1)
    batch_inputs = jax.random.randint(dkeys[6], (B, 3), 0, num_nodes, dtype=jnp.int32)

    forward = jax.jit(spkbgat_forward, static_argnames=("alpha",))
    out_entity, out_relation = forward(params, (edge_list, edge_type),
                                       batch_inputs, train_indices_nhop, alpha=alpha)
    jax.block_until_ready((out_entity, out_relation))

    assert out_entity.shape == (num_nodes, nhid * nheads)
    assert out_relation.shape == (num_relation, nhid * nheads)
    assert bool(jnp.all(jnp.isfinite(out_entity))) and bool(jnp.all(jnp.isfinite(out_relation)))
    print("KERNEL_OK")
</pallas_src>

<mosaic_0001>
module attributes {stable_mosaic.version = 11 : i64} {
  func.func @_l2norm_kernel(%arg0: i32, %arg1: memref<64x32xf32, #tpu.memory_space<vmem>>, %arg2: memref<64x32xf32, #tpu.memory_space<vmem>>) attributes {dimension_semantics = [#tpu.dimension_semantics<parallel>], iteration_bounds = array<i64: 1>, scalar_prefetch = 0 : i64, scratch_operands = 0 : i64, tpu.core_type = #tpu.core_type<tc>, window_params = [{transform_indices = @transform_0, window_bounds = array<i64: 64, 32>}, {transform_indices = @transform_1, window_bounds = array<i64: 64, 32>}]} {
    %c0 = arith.constant 0 : index
    %c0_0 = arith.constant 0 : index
    %0 = vector.load %arg1[%c0, %c0_0] : memref<64x32xf32, #tpu.memory_space<vmem>>, vector<64x32xf32>
    %1 = arith.mulf %0, %0 : vector<64x32xf32>
    %cst = arith.constant dense<0.000000e+00> : vector<64xf32>
    %2 = vector.multi_reduction <add>, %1, %cst [1] : vector<64x32xf32> to vector<64xf32>
    %3 = vector.shape_cast %2 : vector<64xf32> to vector<64x1xf32>
    %cst_1 = arith.constant 1.000000e-24 : f32
    %4 = vector.broadcast %cst_1 : f32 to vector<64x1xf32>
    %5 = arith.maximumf %3, %4 : vector<64x1xf32>
    %6 = math.rsqrt %5 : vector<64x1xf32>
    %7 = vector.broadcast %6 : vector<64x1xf32> to vector<64x32xf32>
    %8 = arith.mulf %0, %7 : vector<64x32xf32>
    %c0_2 = arith.constant 0 : index
    %c0_3 = arith.constant 0 : index
    %9 = vector.load %arg2[%c0_2, %c0_3] : memref<64x32xf32, #tpu.memory_space<vmem>>, vector<64x32xf32>
    tpu.vector_store %arg2[%c0_2, %c0_3], %8 {strides = array<i32>} : memref<64x32xf32, #tpu.memory_space<vmem>>, vector<64x32xf32>,
    return
  }
  func.func @transform_0(%arg0: i32) -> (i32, i32) {
    %c0_i32 = arith.constant 0 : i32
    %c0_i32_0 = arith.constant 0 : i32
    return %arg0, %c0_i32 : i32, i32
  }
  func.func @transform_1(%arg0: i32) -> (i32, i32) {
    %c0_i32 = arith.constant 0 : i32
    %c0_i32_0 = arith.constant 0 : i32
    return %arg0, %c0_i32 : i32, i32
  }
}

module attributes {stable_mosaic.version = 11 : i64} {
  func.func @_edge_attn_kernel(%arg0: i32, %arg1: memref<64x32xbf16, #tpu.memory_space<vmem>>, %arg2: memref<64x32xbf16, #tpu.memory_space<vmem>>, %arg3: memref<64x32xbf16, #tpu.memory_space<vmem>>, %arg4: memref<32x128xbf16, #tpu.memory_space<vmem>>, %arg5: memref<32x128xbf16, #tpu.memory_space<vmem>>, %arg6: memref<32x128xbf16, #tpu.memory_space<vmem>>, %arg7: memref<64x128xf32, #tpu.memory_space<vmem>>) attributes {dimension_semantics = [#tpu.dimension_semantics<parallel>], iteration_bounds = array<i64: 1>, scalar_prefetch = 0 : i64, scratch_operands = 0 : i64, tpu.core_type = #tpu.core_type<tc>, window_params = [{transform_indices = @transform_0, window_bounds = array<i64: 64, 32>}, {transform_indices = @transform_1, window_bounds = array<i64: 64, 32>}, {transform_indices = @transform_2, window_bounds = array<i64: 64, 32>}, {pipeline_mode = #tpu.pipeline_mode<synchronous>, transform_indices = @transform_3, window_bounds = array<i64: 32, 128>}, {pipeline_mode = #tpu.pipeline_mode<synchronous>, transform_indices = @transform_4, window_bounds = array<i64: 32, 128>}, {pipeline_mode = #tpu.pipeline_mode<synchronous>, transform_indices = @transform_5, window_bounds = array<i64: 32, 128>}, {transform_indices = @transform_6, window_bounds = array<i64: 64, 128>}]} {
    %c0 = arith.constant 0 : index
    %c0_0 = arith.constant 0 : index
    %0 = vector.load %arg1[%c0, %c0_0] : memref<64x32xbf16, #tpu.memory_space<vmem>>, vector<64x32xbf16>
    %c0_1 = arith.constant 0 : index
    %c0_2 = arith.constant 0 : index
    %1 = vector.load %arg4[%c0_1, %c0_2] : memref<32x128xbf16, #tpu.memory_space<vmem>>, vector<32x128xbf16>
    %cst = arith.constant dense<0.000000e+00> : vector<64x128xf32>
    %2 = tpu.matmul %0, %1, %cst {dimension_numbers = #tpu.dot_dimension_numbers<[1], [0], [0], [1], [0, 0, 1, 1], [], []>} : vector<64x32xbf16>, vector<32x128xbf16>, vector<64x128xf32> -> vector<64x128xf32>
    %c0_3 = arith.constant 0 : index
    %c0_4 = arith.constant 0 : index
    %3 = vector.load %arg2[%c0_3, %c0_4] : memref<64x32xbf16, #tpu.memory_space<vmem>>, vector<64x32xbf16>
    %c0_5 = arith.constant 0 : index
    %c0_6 = arith.constant 0 : index
    %4 = vector.load %arg5[%c0_5, %c0_6] : memref<32x128xbf16, #tpu.memory_space<vmem>>, vector<32x128xbf16>
    %cst_7 = arith.constant dense<0.000000e+00> : vector<64x128xf32>
    %5 = tpu.matmul %3, %4, %cst_7 {dimension_numbers = #tpu.dot_dimension_numbers<[1], [0], [0], [1], [0, 0, 1, 1], [], []>} : vector<64x32xbf16>, vector<32x128xbf16>, vector<64x128xf32> -> vector<64x128xf32>
    %6 = arith.addf %2, %5 : vector<64x128xf32>
    %c0_8 = arith.constant 0 : index
    %c0_9 = arith.constant 0 : index
    %7 = vector.load %arg3[%c0_8, %c0_9] : memref<64x32xbf16, #tpu.memory_space<vmem>>, vector<64x32xbf16>
    %c0_10 = arith.constant 0 : index
    %c0_11 = arith.constant 0 : index
    %8 = vector.load %arg6[%c0_10, %c0_11] : memref<32x128xbf16, #tpu.memory_space<vmem>>, vector<32x128xbf16>
    %cst_12 = arith.constant dense<0.000000e+00> : vector<64x128xf32>
    %9 = tpu.matmul %7, %8, %cst_12 {dimension_numbers = #tpu.dot_dimension_numbers<[1], [0], [0], [1], [0, 0, 1, 1], [], []>} : vector<64x32xbf16>, vector<32x128xbf16>, vector<64x128xf32> -> vector<64x128xf32>
    %10 = arith.addf %6, %9 : vector<64x128xf32>
    %11 = vector.extract_strided_slice %10 {offsets = [0, 64], sizes = [64, 1], strides = [1, 1]} : vector<64x128xf32> to vector<64x1xf32>
    %cst_13 = arith.constant 0.000000e+00 : f32
    %12 = vector.broadcast %cst_13 : f32 to vector<64x1xf32>
    %13 = arith.cmpf ogt, %11, %12 : vector<64x1xf32>
    %cst_14 = arith.constant 2.000000e-01 : f32
    %14 = vector.broadcast %cst_14 : f32 to vector<64x1xf32>
    %15 = arith.mulf %14, %11 : vector<64x1xf32>
    %16 = arith.select %13, %11, %15 : vector<64x1xi1>, vector<64x1xf32>
    %cst_15 = arith.constant 0.000000e+00 : f32
    %17 = vector.broadcast %cst_15 : f32 to vector<64x1xf32>
    %18 = arith.subf %17, %16 : vector<64x1xf32>
    %19 = math.exp %18 : vector<64x1xf32>
    %20 = vector.extract_strided_slice %10 {offsets = [0, 0], sizes = [64, 32], strides = [1, 1]} : vector<64x128xf32> to vector<64x32xf32>
    %21 = vector.broadcast %19 : vector<64x1xf32> to vector<64x32xf32>
    %22 = arith.mulf %21, %20 : vector<64x32xf32>
    %23 = vector.extract_strided_slice %10 {offsets = [0, 65], sizes = [64, 1], strides = [1, 1]} : vector<64x128xf32> to vector<64x1xf32>
    %cst_16 = arith.constant 0.000000e+00 : f32
    %24 = vector.broadcast %cst_16 : f32 to vector<64x1xf32>
    %25 = arith.cmpf ogt, %23, %24 : vector<64x1xf32>
    %cst_17 = arith.constant 2.000000e-01 : f32
    %26 = vector.broadcast %cst_17 : f32 to vector<64x1xf32>
    %27 = arith.mulf %26, %23 : vector<64x1xf32>
    %28 = arith.select %25, %23, %27 : vector<64x1xi1>, vector<64x1xf32>
    %cst_18 = arith.constant 0.000000e+00 : f32
    %29 = vector.broadcast %cst_18 : f32 to vector<64x1xf32>
    %30 = arith.subf %29, %28 : vector<64x1xf32>
    %31 = math.exp %30 : vector<64x1xf32>
    %32 = vector.extract_strided_slice %10 {offsets = [0, 32], sizes = [64, 32], strides = [1, 1]} : vector<64x128xf32> to vector<64x32xf32>
    %33 = vector.broadcast %31 : vector<64x1xf32> to vector<64x32xf32>
    %34 = arith.mulf %33, %32 : vector<64x32xf32>
    %cst_19 = arith.constant 0.000000e+00 : f32
    %35 = vector.broadcast %cst_19 : f32 to vector<64x62xf32>
    %36 = tpu.concatenate %22, %34, %19, %31, %35 in 1 : vector<64x32xf32>, vector<64x32xf32>, vector<64x1xf32>, vector<64x1xf32>, vector<64x62xf32> -> vector<64x128xf32>
    %c0_20 = arith.constant 0 : index
    %c0_21 = arith.constant 0 : index
    %37 = vector.load %arg7[%c0_20, %c0_21] : memref<64x128xf32, #tpu.memory_space<vmem>>, vector<64x128xf32>
    tpu.vector_store %arg7[%c0_20, %c0_21], %36 {strides = array<i32>} : memref<64x128xf32, #tpu.memory_space<vmem>>, vector<64x128xf32>,
    return
  }
  func.func @transform_0(%arg0: i32) -> (i32, i32) {
    %c0_i32 = arith.constant 0 : i32
    %c0_i32_0 = arith.constant 0 : i32
    return %arg0, %c0_i32 : i32, i32
  }
  func.func @transform_1(%arg0: i32) -> (i32, i32) {
    %c0_i32 = arith.constant 0 : i32
    %c0_i32_0 = arith.constant 0 : i32
    return %arg0, %c0_i32 : i32, i32
  }
  func.func @transform_2(%arg0: i32) -> (i32, i32) {
    %c0_i32 = arith.constant 0 : i32
    %c0_i32_0 = arith.constant 0 : i32
    return %arg0, %c0_i32 : i32, i32
  }
  func.func @transform_3(%arg0: i32) -> (i32, i32) {
    %c0_i32 = arith.constant 0 : i32
    %c0_i32_0 = arith.constant 0 : i32
    %c0_i32_1 = arith.constant 0 : i32
    return %c0_i32, %c0_i32_0 : i32, i32
  }
  func.func @transform_4(%arg0: i32) -> (i32, i32) {
    %c0_i32 = arith.constant 0 : i32
    %c0_i32_0 = arith.constant 0 : i32
    %c0_i32_1 = arith.constant 0 : i32
    return %c0_i32, %c0_i32_0 : i32, i32
  }
  func.func @transform_5(%arg0: i32) -> (i32, i32) {
    %c0_i32 = arith.constant 0 : i32
    %c0_i32_0 = arith.constant 0 : i32
    %c0_i32_1 = arith.constant 0 : i32
    return %c0_i32, %c0_i32_0 : i32, i32
  }
  func.func @transform_6(%arg0: i32) -> (i32, i32) {
    %c0_i32 = arith.constant 0 : i32
    %c0_i32_0 = arith.constant 0 : i32
    return %arg0, %c0_i32 : i32, i32
  }
}

module attributes {stable_mosaic.version = 11 : i64} {
  func.func @_finalize_kernel(%arg0: i32, %arg1: memref<64x128xf32, #tpu.memory_space<vmem>>, %arg2: memref<64x64xf32, #tpu.memory_space<vmem>>) attributes {dimension_semantics = [#tpu.dimension_semantics<parallel>], iteration_bounds = array<i64: 1>, scalar_prefetch = 0 : i64, scratch_operands = 0 : i64, tpu.core_type = #tpu.core_type<tc>, window_params = [{transform_indices = @transform_0, window_bounds = array<i64: 64, 128>}, {transform_indices = @transform_1, window_bounds = array<i64: 64, 64>}]} {
    %c0 = arith.constant 0 : index
    %c0_0 = arith.constant 0 : index
    %0 = vector.load %arg1[%c0, %c0_0] : memref<64x128xf32, #tpu.memory_space<vmem>>, vector<64x128xf32>
    %1 = vector.extract_strided_slice %0 {offsets = [0, 64], sizes = [64, 1], strides = [1, 1]} : vector<64x128xf32> to vector<64x1xf32>
    %cst = arith.constant 0.000000e+00 : f32
    %2 = vector.broadcast %cst : f32 to vector<64x1xf32>
    %3 = arith.cmpf oeq, %1, %2 : vector<64x1xf32>
    %cst_1 = arith.constant 9.99999996E-13 : f32
    %4 = vector.broadcast %cst_1 : f32 to vector<64x1xf32>
    %5 = arith.select %3, %4, %1 : vector<64x1xi1>, vector<64x1xf32>
    %6 = vector.extract_strided_slice %0 {offsets = [0, 0], sizes = [64, 32], strides = [1, 1]} : vector<64x128xf32> to vector<64x32xf32>
    %7 = tpu.reciprocal %5 {approx = true} : vector<64x1xf32> -> vector<64x1xf32>
    %8 = vector.broadcast %7 : vector<64x1xf32> to vector<64x32xf32>
    %9 = arith.mulf %6, %8 : vector<64x32xf32>
    %cst_2 = arith.constant 0.000000e+00 : f32
    %10 = vector.broadcast %cst_2 : f32 to vector<64x32xf32>
    %11 = arith.cmpf ogt, %9, %10 : vector<64x32xf32>
    %12 = math.exp %9 : vector<64x32xf32>
    %cst_3 = arith.constant 1.000000e+00 : f32
    %13 = vector.broadcast %cst_3 : f32 to vector<64x32xf32>
    %14 = arith.subf %12, %13 : vector<64x32xf32>
    %15 = arith.select %11, %9, %14 : vector<64x32xi1>, vector<64x32xf32>
    %16 = vector.extract_strided_slice %0 {offsets = [0, 65], sizes = [64, 1], strides = [1, 1]} : vector<64x128xf32> to vector<64x1xf32>
    %cst_4 = arith.constant 0.000000e+00 : f32
    %17 = vector.broadcast %cst_4 : f32 to vector<64x1xf32>
    %18 = arith.cmpf oeq, %16, %17 : vector<64x1xf32>
    %cst_5 = arith.constant 9.99999996E-13 : f32
    %19 = vector.broadcast %cst_5 : f32 to vector<64x1xf32>
    %20 = arith.select %18, %19, %16 : vector<64x1xi1>, vector<64x1xf32>
    %21 = vector.extract_strided_slice %0 {offsets = [0, 32], sizes = [64, 32], strides = [1, 1]} : vector<64x128xf32> to vector<64x32xf32>
    %22 = tpu.reciprocal %20 {approx = true} : vector<64x1xf32> -> vector<64x1xf32>
    %23 = vector.broadcast %22 : vector<64x1xf32> to vector<64x32xf32>
    %24 = arith.mulf %21, %23 : vector<64x32xf32>
    %cst_6 = arith.constant 0.000000e+00 : f32
    %25 = vector.broadcast %cst_6 : f32 to vector<64x32xf32>
    %26 = arith.cmpf ogt, %24, %25 : vector<64x32xf32>
    %27 = math.exp %24 : vector<64x32xf32>
    %cst_7 = arith.constant 1.000000e+00 : f32
    %28 = vector.broadcast %cst_7 : f32 to vector<64x32xf32>
    %29 = arith.subf %27, %28 : vector<64x32xf32>
    %30 = arith.select %26, %24, %29 : vector<64x32xi1>, vector<64x32xf32>
    %31 = tpu.concatenate %15, %30 in 1 : vector<64x32xf32>, vector<64x32xf32> -> vector<64x64xf32>
    %c0_8 = arith.constant 0 : index
    %c0_9 = arith.constant 0 : index
    %32 = vector.load %arg2[%c0_8, %c0_9] : memref<64x64xf32, #tpu.memory_space<vmem>>, vector<64x64xf32>
    tpu.vector_store %arg2[%c0_8, %c0_9], %31 {strides = array<i32>} : memref<64x64xf32, #tpu.memory_space<vmem>>, vector<64x64xf32>,
    return
  }
  func.func @transform_0(%arg0: i32) -> (i32, i32) {
    %c0_i32 = arith.constant 0 : i32
    %c0_i32_0 = arith.constant 0 : i32
    return %arg0, %c0_i32 : i32, i32
  }
  func.func @transform_1(%arg0: i32) -> (i32, i32) {
    %c0_i32 = arith.constant 0 : i32
    %c0_i32_0 = arith.constant 0 : i32
    return %arg0, %c0_i32 : i32, i32
  }
}

module attributes {stable_mosaic.version = 11 : i64} {
  func.func @_matmul_kernel(%arg0: i32, %arg1: i32, %arg2: i32, %arg3: memref<16x128xbf16, #tpu.memory_space<vmem>>, %arg4: memref<128x128xbf16, #tpu.memory_space<vmem>>, %arg5: memref<16x128xf32, #tpu.memory_space<vmem>>, %arg6: memref<16x128xf32, #tpu.memory_space<vmem>>) attributes {dimension_semantics = [#tpu.dimension_semantics<parallel>, #tpu.dimension_semantics<parallel>, #tpu.dimension_semantics<arbitrary>], iteration_bounds = array<i64: 1, 1, 1>, scalar_prefetch = 0 : i64, scratch_operands = 1 : i64, tpu.core_type = #tpu.core_type<tc>, window_params = [{transform_indices = @transform_0, window_bounds = array<i64: 16, 128>}, {transform_indices = @transform_1, window_bounds = array<i64: 128, 128>}, {transform_indices = @transform_2, window_bounds = array<i64: 16, 128>}]} {
    %c0_i32 = arith.constant 0 : i32
    %0 = arith.cmpi eq, %arg2, %c0_i32 : i32
    %1 = arith.extui %0 : i1 to i32
    %c0_i32_0 = arith.constant 0 : i32
    %2 = arith.cmpi ne, %1, %c0_i32_0 : i32
    scf.if %2 {
      %cst_10 = arith.constant 0.000000e+00 : f32
      %12 = vector.broadcast %cst_10 : f32 to vector<16x128xf32>
      %c0_11 = arith.constant 0 : index
      %c0_12 = arith.constant 0 : index
      %13 = vector.load %arg6[%c0_11, %c0_12] : memref<16x128xf32, #tpu.memory_space<vmem>>, vector<16x128xf32>
      tpu.vector_store %arg6[%c0_11, %c0_12], %12 {strides = array<i32>} : memref<16x128xf32, #tpu.memory_space<vmem>>, vector<16x128xf32>,
    } else {
    }
    %c0 = arith.constant 0 : index
    %c0_1 = arith.constant 0 : index
    %3 = vector.load %arg6[%c0, %c0_1] : memref<16x128xf32, #tpu.memory_space<vmem>>, vector<16x128xf32>
    %c0_2 = arith.constant 0 : index
    %c0_3 = arith.constant 0 : index
    %4 = vector.load %arg3[%c0_2, %c0_3] : memref<16x128xbf16, #tpu.memory_space<vmem>>, vector<16x128xbf16>
    %c0_4 = arith.constant 0 : index
    %c0_5 = arith.constant 0 : index
    %5 = vector.load %arg4[%c0_4, %c0_5] : memref<128x128xbf16, #tpu.memory_space<vmem>>, vector<128x128xbf16>
    %cst = arith.constant dense<0.000000e+00> : vector<16x128xf32>
    %6 = tpu.matmul %4, %5, %cst {dimension_numbers = #tpu.dot_dimension_numbers<[1], [0], [0], [1], [0, 0, 1, 1], [], []>} : vector<16x128xbf16>, vector<128x128xbf16>, vector<16x128xf32> -> vector<16x128xf32>
    %7 = arith.addf %3, %6 : vector<16x128xf32>
    %c0_6 = arith.constant 0 : index
    %c0_7 = arith.constant 0 : index
    %8 = vector.load %arg6[%c0_6, %c0_7] : memref<16x128xf32, #tpu.memory_space<vmem>>, vector<16x128xf32>
    tpu.vector_store %arg6[%c0_6, %c0_7], %7 {strides = array<i32>} : memref<16x128xf32, #tpu.memory_space<vmem>>, vector<16x128xf32>,
    %c0_i32_8 = arith.constant 0 : i32
    %9 = arith.cmpi eq, %arg2, %c0_i32_8 : i32
    %10 = arith.extui %9 : i1 to i32
    %c0_i32_9 = arith.constant 0 : i32
    %11 = arith.cmpi ne, %10, %c0_i32_9 : i32
    scf.if %11 {
      %c0_10 = arith.constant 0 : index
      %c0_11 = arith.constant 0 : index
      %12 = vector.load %arg6[%c0_10, %c0_11] : memref<16x128xf32, #tpu.memory_space<vmem>>, vector<16x128xf32>
      %c0_12 = arith.constant 0 : index
      %c0_13 = arith.constant 0 : index
      %13 = vector.load %arg5[%c0_12, %c0_13] : memref<16x128xf32, #tpu.memory_space<vmem>>, vector<16x128xf32>
      tpu.vector_store %arg5[%c0_12, %c0_13], %12 {strides = array<i32>} : memref<16x128xf32, #tpu.memory_space<vmem>>, vector<16x128xf32>,
    } else {
    }
    return
  }
  func.func @transform_0(%arg0: i32, %arg1: i32, %arg2: i32) -> (i32, i32) {
    %c0_i32 = arith.constant 0 : i32
    return %arg0, %arg2 : i32, i32
  }
  func.func @transform_1(%arg0: i32, %arg1: i32, %arg2: i32) -> (i32, i32) {
    %c0_i32 = arith.constant 0 : i32
    return %arg2, %arg1 : i32, i32
  }
  func.func @transform_2(%arg0: i32, %arg1: i32, %arg2: i32) -> (i32, i32) {
    %c0_i32 = arith.constant 0 : i32
    return %arg0, %arg1 : i32, i32
  }
}

module attributes {stable_mosaic.version = 11 : i64} {
  func.func @_edge_attn_kernel(%arg0: i32, %arg1: memref<64x64xbf16, #tpu.memory_space<vmem>>, %arg2: memref<64x64xbf16, #tpu.memory_space<vmem>>, %arg3: memref<64x64xbf16, #tpu.memory_space<vmem>>, %arg4: memref<64x128xbf16, #tpu.memory_space<vmem>>, %arg5: memref<64x128xbf16, #tpu.memory_space<vmem>>, %arg6: memref<64x128xbf16, #tpu.memory_space<vmem>>, %arg7: memref<64x128xf32, #tpu.memory_space<vmem>>) attributes {dimension_semantics = [#tpu.dimension_semantics<parallel>], iteration_bounds = array<i64: 1>, scalar_prefetch = 0 : i64, scratch_operands = 0 : i64, tpu.core_type = #tpu.core_type<tc>, window_params = [{transform_indices = @transform_0, window_bounds = array<i64: 64, 64>}, {transform_indices = @transform_1, window_bounds = array<i64: 64, 64>}, {transform_indices = @transform_2, window_bounds = array<i64: 64, 64>}, {pipeline_mode = #tpu.pipeline_mode<synchronous>, transform_indices = @transform_3, window_bounds = array<i64: 64, 128>}, {pipeline_mode = #tpu.pipeline_mode<synchronous>, transform_indices = @transform_4, window_bounds = array<i64: 64, 128>}, {pipeline_mode = #tpu.pipeline_mode<synchronous>, transform_indices = @transform_5, window_bounds = array<i64: 64, 128>}, {transform_indices = @transform_6, window_bounds = array<i64: 64, 128>}]} {
    %c0 = arith.constant 0 : index
    %c0_0 = arith.constant 0 : index
    %0 = vector.load %arg1[%c0, %c0_0] : memref<64x64xbf16, #tpu.memory_space<vmem>>, vector<64x64xbf16>
    %c0_1 = arith.constant 0 : index
    %c0_2 = arith.constant 0 : index
    %1 = vector.load %arg4[%c0_1, %c0_2] : memref<64x128xbf16, #tpu.memory_space<vmem>>, vector<64x128xbf16>
    %cst = arith.constant dense<0.000000e+00> : vector<64x128xf32>
    %2 = tpu.matmul %0, %1, %cst {dimension_numbers = #tpu.dot_dimension_numbers<[1], [0], [0], [1], [0, 0, 1, 1], [], []>} : vector<64x64xbf16>, vector<64x128xbf16>, vector<64x128xf32> -> vector<64x128xf32>
    %c0_3 = arith.constant 0 : index
    %c0_4 = arith.constant 0 : index
    %3 = vector.load %arg2[%c0_3, %c0_4] : memref<64x64xbf16, #tpu.memory_space<vmem>>, vector<64x64xbf16>
    %c0_5 = arith.constant 0 : index
    %c0_6 = arith.constant 0 : index
    %4 = vector.load %arg5[%c0_5, %c0_6] : memref<64x128xbf16, #tpu.memory_space<vmem>>, vector<64x128xbf16>
    %cst_7 = arith.constant dense<0.000000e+00> : vector<64x128xf32>
    %5 = tpu.matmul %3, %4, %cst_7 {dimension_numbers = #tpu.dot_dimension_numbers<[1], [0], [0], [1], [0, 0, 1, 1], [], []>} : vector<64x64xbf16>, vector<64x128xbf16>, vector<64x128xf32> -> vector<64x128xf32>
    %6 = arith.addf %2, %5 : vector<64x128xf32>
    %c0_8 = arith.constant 0 : index
    %c0_9 = arith.constant 0 : index
    %7 = vector.load %arg3[%c0_8, %c0_9] : memref<64x64xbf16, #tpu.memory_space<vmem>>, vector<64x64xbf16>
    %c0_10 = arith.constant 0 : index
    %c0_11 = arith.constant 0 : index
    %8 = vector.load %arg6[%c0_10, %c0_11] : memref<64x128xbf16, #tpu.memory_space<vmem>>, vector<64x128xbf16>
    %cst_12 = arith.constant dense<0.000000e+00> : vector<64x128xf32>
    %9 = tpu.matmul %7, %8, %cst_12 {dimension_numbers = #tpu.dot_dimension_numbers<[1], [0], [0], [1], [0, 0, 1, 1], [], []>} : vector<64x64xbf16>, vector<64x128xbf16>, vector<64x128xf32> -> vector<64x128xf32>
    %10 = arith.addf %6, %9 : vector<64x128xf32>
    %11 = vector.extract_strided_slice %10 {offsets = [0, 64], sizes = [64, 1], strides = [1, 1]} : vector<64x128xf32> to vector<64x1xf32>
    %cst_13 = arith.constant 0.000000e+00 : f32
    %12 = vector.broadcast %cst_13 : f32 to vector<64x1xf32>
    %13 = arith.cmpf ogt, %11, %12 : vector<64x1xf32>
    %cst_14 = arith.constant 2.000000e-01 : f32
    %14 = vector.broadcast %cst_14 : f32 to vector<64x1xf32>
    %15 = arith.mulf %14, %11 : vector<64x1xf32>
    %16 = arith.select %13, %11, %15 : vector<64x1xi1>, vector<64x1xf32>
    %cst_15 = arith.constant 0.000000e+00 : f32
    %17 = vector.broadcast %cst_15 : f32 to vector<64x1xf32>
    %18 = arith.subf %17, %16 : vector<64x1xf32>
    %19 = math.exp %18 : vector<64x1xf32>
    %20 = vector.extract_strided_slice %10 {offsets = [0, 0], sizes = [64, 64], strides = [1, 1]} : vector<64x128xf32> to vector<64x64xf32>
    %21 = vector.broadcast %19 : vector<64x1xf32> to vector<64x64xf32>
    %22 = arith.mulf %21, %20 : vector<64x64xf32>
    %cst_16 = arith.constant 0.000000e+00 : f32
    %23 = vector.broadcast %cst_16 : f32 to vector<64x63xf32>
    %24 = tpu.concatenate %22, %19, %23 in 1 : vector<64x64xf32>, vector<64x1xf32>, vector<64x63xf32> -> vector<64x128xf32>
    %c0_17 = arith.constant 0 : index
    %c0_18 = arith.constant 0 : index
    %25 = vector.load %arg7[%c0_17, %c0_18] : memref<64x128xf32, #tpu.memory_space<vmem>>, vector<64x128xf32>
    tpu.vector_store %arg7[%c0_17, %c0_18], %24 {strides = array<i32>} : memref<64x128xf32, #tpu.memory_space<vmem>>, vector<64x128xf32>,
    return
  }
  func.func @transform_0(%arg0: i32) -> (i32, i32) {
    %c0_i32 = arith.constant 0 : i32
    %c0_i32_0 = arith.constant 0 : i32
    return %arg0, %c0_i32 : i32, i32
  }
  func.func @transform_1(%arg0: i32) -> (i32, i32) {
    %c0_i32 = arith.constant 0 : i32
    %c0_i32_0 = arith.constant 0 : i32
    return %arg0, %c0_i32 : i32, i32
  }
  func.func @transform_2(%arg0: i32) -> (i32, i32) {
    %c0_i32 = arith.constant 0 : i32
    %c0_i32_0 = arith.constant 0 : i32
    return %arg0, %c0_i32 : i32, i32
  }
  func.func @transform_3(%arg0: i32) -> (i32, i32) {
    %c0_i32 = arith.constant 0 : i32
    %c0_i32_0 = arith.constant 0 : i32
    %c0_i32_1 = arith.constant 0 : i32
    return %c0_i32, %c0_i32_0 : i32, i32
  }
  func.func @transform_4(%arg0: i32) -> (i32, i32) {
    %c0_i32 = arith.constant 0 : i32
    %c0_i32_0 = arith.constant 0 : i32
    %c0_i32_1 = arith.constant 0 : i32
    return %c0_i32, %c0_i32_0 : i32, i32
  }
  func.func @transform_5(%arg0: i32) -> (i32, i32) {
    %c0_i32 = arith.constant 0 : i32
    %c0_i32_0 = arith.constant 0 : i32
    %c0_i32_1 = arith.constant 0 : i32
    return %c0_i32, %c0_i32_0 : i32, i32
  }
  func.func @transform_6(%arg0: i32) -> (i32, i32) {
    %c0_i32 = arith.constant 0 : i32
    %c0_i32_0 = arith.constant 0 : i32
    return %arg0, %c0_i32 : i32, i32
  }
}

module attributes {stable_mosaic.version = 11 : i64} {
  func.func @_matmul_kernel(%arg0: i32, %arg1: i32, %arg2: i32, %arg3: memref<64x128xbf16, #tpu.memory_space<vmem>>, %arg4: memref<128x128xbf16, #tpu.memory_space<vmem>>, %arg5: memref<64x128xf32, #tpu.memory_space<vmem>>, %arg6: memref<64x128xf32, #tpu.memory_space<vmem>>) attributes {dimension_semantics = [#tpu.dimension_semantics<parallel>, #tpu.dimension_semantics<parallel>, #tpu.dimension_semantics<arbitrary>], iteration_bounds = array<i64: 1, 1, 1>, scalar_prefetch = 0 : i64, scratch_operands = 1 : i64, tpu.core_type = #tpu.core_type<tc>, window_params = [{transform_indices = @transform_0, window_bounds = array<i64: 64, 128>}, {transform_indices = @transform_1, window_bounds = array<i64: 128, 128>}, {transform_indices = @transform_2, window_bounds = array<i64: 64, 128>}]} {
    %c0_i32 = arith.constant 0 : i32
    %0 = arith.cmpi eq, %arg2, %c0_i32 : i32
    %1 = arith.extui %0 : i1 to i32
    %c0_i32_0 = arith.constant 0 : i32
    %2 = arith.cmpi ne, %1, %c0_i32_0 : i32
    scf.if %2 {
      %cst_10 = arith.constant 0.000000e+00 : f32
      %12 = vector.broadcast %cst_10 : f32 to vector<64x128xf32>
      %c0_11 = arith.constant 0 : index
      %c0_12 = arith.constant 0 : index
      %13 = vector.load %arg6[%c0_11, %c0_12] : memref<64x128xf32, #tpu.memory_space<vmem>>, vector<64x128xf32>
      tpu.vector_store %arg6[%c0_11, %c0_12], %12 {strides = array<i32>} : memref<64x128xf32, #tpu.memory_space<vmem>>, vector<64x128xf32>,
    } else {
    }
    %c0 = arith.constant 0 : index
    %c0_1 = arith.constant 0 : index
    %3 = vector.load %arg6[%c0, %c0_1] : memref<64x128xf32, #tpu.memory_space<vmem>>, vector<64x128xf32>
    %c0_2 = arith.constant 0 : index
    %c0_3 = arith.constant 0 : index
    %4 = vector.load %arg3[%c0_2, %c0_3] : memref<64x128xbf16, #tpu.memory_space<vmem>>, vector<64x128xbf16>
    %c0_4 = arith.constant 0 : index
    %c0_5 = arith.constant 0 : index
    %5 = vector.load %arg4[%c0_4, %c0_5] : memref<128x128xbf16, #tpu.memory_space<vmem>>, vector<128x128xbf16>
    %cst = arith.constant dense<0.000000e+00> : vector<64x128xf32>
    %6 = tpu.matmul %4, %5, %cst {dimension_numbers = #tpu.dot_dimension_numbers<[1], [0], [0], [1], [0, 0, 1, 1], [], []>} : vector<64x128xbf16>, vector<128x128xbf16>, vector<64x128xf32> -> vector<64x128xf32>
    %7 = arith.addf %3, %6 : vector<64x128xf32>
    %c0_6 = arith.constant 0 : index
    %c0_7 = arith.constant 0 : index
    %8 = vector.load %arg6[%c0_6, %c0_7] : memref<64x128xf32, #tpu.memory_space<vmem>>, vector<64x128xf32>
    tpu.vector_store %arg6[%c0_6, %c0_7], %7 {strides = array<i32>} : memref<64x128xf32, #tpu.memory_space<vmem>>, vector<64x128xf32>,
    %c0_i32_8 = arith.constant 0 : i32
    %9 = arith.cmpi eq, %arg2, %c0_i32_8 : i32
    %10 = arith.extui %9 : i1 to i32
    %c0_i32_9 = arith.constant 0 : i32
    %11 = arith.cmpi ne, %10, %c0_i32_9 : i32
    scf.if %11 {
      %c0_10 = arith.constant 0 : index
      %c0_11 = arith.constant 0 : index
      %12 = vector.load %arg6[%c0_10, %c0_11] : memref<64x128xf32, #tpu.memory_space<vmem>>, vector<64x128xf32>
      %c0_12 = arith.constant 0 : index
      %c0_13 = arith.constant 0 : index
      %13 = vector.load %arg5[%c0_12, %c0_13] : memref<64x128xf32, #tpu.memory_space<vmem>>, vector<64x128xf32>
      tpu.vector_store %arg5[%c0_12, %c0_13], %12 {strides = array<i32>} : memref<64x128xf32, #tpu.memory_space<vmem>>, vector<64x128xf32>,
    } else {
    }
    return
  }
  func.func @transform_0(%arg0: i32, %arg1: i32, %arg2: i32) -> (i32, i32) {
    %c0_i32 = arith.constant 0 : i32
    return %arg0, %arg2 : i32, i32
  }
  func.func @transform_1(%arg0: i32, %arg1: i32, %arg2: i32) -> (i32, i32) {
    %c0_i32 = arith.constant 0 : i32
    return %arg2, %arg1 : i32, i32
  }
  func.func @transform_2(%arg0: i32, %arg1: i32, %arg2: i32) -> (i32, i32) {
    %c0_i32 = arith.constant 0 : i32
    return %arg0, %arg1 : i32, i32
  }
}

module attributes {stable_mosaic.version = 11 : i64} {
  func.func @_finalize_combine_norm_kernel(%arg0: i32, %arg1: memref<64x128xf32, #tpu.memory_space<vmem>>, %arg2: memref<64x64xf32, #tpu.memory_space<vmem>>, %arg3: memref<64x1xf32, #tpu.memory_space<vmem>>, %arg4: memref<64x64xf32, #tpu.memory_space<vmem>>) attributes {dimension_semantics = [#tpu.dimension_semantics<parallel>], iteration_bounds = array<i64: 1>, scalar_prefetch = 0 : i64, scratch_operands = 0 : i64, tpu.core_type = #tpu.core_type<tc>, window_params = [{transform_indices = @transform_0, window_bounds = array<i64: 64, 128>}, {transform_indices = @transform_1, window_bounds = array<i64: 64, 64>}, {transform_indices = @transform_2, window_bounds = array<i64: 64, 1>}, {transform_indices = @transform_3, window_bounds = array<i64: 64, 64>}]} {
    %c0 = arith.constant 0 : index
    %c0_0 = arith.constant 0 : index
    %0 = vector.load %arg1[%c0, %c0_0] : memref<64x128xf32, #tpu.memory_space<vmem>>, vector<64x128xf32>
    %1 = vector.extract_strided_slice %0 {offsets = [0, 64], sizes = [64, 1], strides = [1, 1]} : vector<64x128xf32> to vector<64x1xf32>
    %cst = arith.constant 0.000000e+00 : f32
    %2 = vector.broadcast %cst : f32 to vector<64x1xf32>
    %3 = arith.cmpf oeq, %1, %2 : vector<64x1xf32>
    %cst_1 = arith.constant 9.99999996E-13 : f32
    %4 = vector.broadcast %cst_1 : f32 to vector<64x1xf32>
    %5 = arith.select %3, %4, %1 : vector<64x1xi1>, vector<64x1xf32>
    %6 = vector.extract_strided_slice %0 {offsets = [0, 0], sizes = [64, 64], strides = [1, 1]} : vector<64x128xf32> to vector<64x64xf32>
    %7 = tpu.reciprocal %5 {approx = true} : vector<64x1xf32> -> vector<64x1xf32>
    %8 = vector.broadcast %7 : vector<64x1xf32> to vector<64x64xf32>
    %9 = arith.mulf %6, %8 : vector<64x64xf32>
    %cst_2 = arith.constant 0.000000e+00 : f32
    %10 = vector.broadcast %cst_2 : f32 to vector<64x64xf32>
    %11 = arith.cmpf ogt, %9, %10 : vector<64x64xf32>
    %12 = math.exp %9 : vector<64x64xf32>
    %cst_3 = arith.constant 1.000000e+00 : f32
    %13 = vector.broadcast %cst_3 : f32 to vector<64x64xf32>
    %14 = arith.subf %12, %13 : vector<64x64xf32>
    %15 = arith.select %11, %9, %14 : vector<64x64xi1>, vector<64x64xf32>
    %c0_4 = arith.constant 0 : index
    %c0_5 = arith.constant 0 : index
    %16 = vector.load %arg2[%c0_4, %c0_5] : memref<64x64xf32, #tpu.memory_space<vmem>>, vector<64x64xf32>
    %c0_6 = arith.constant 0 : index
    %c0_7 = arith.constant 0 : index
    %17 = vector.load %arg3[%c0_6, %c0_7] : memref<64x1xf32, #tpu.memory_space<vmem>>, vector<64x1xf32>
    %18 = vector.broadcast %17 : vector<64x1xf32> to vector<64x64xf32>
    %19 = arith.mulf %18, %15 : vector<64x64xf32>
    %20 = arith.addf %16, %19 : vector<64x64xf32>
    %21 = arith.mulf %20, %20 : vector<64x64xf32>
    %cst_8 = arith.constant dense<0.000000e+00> : vector<64xf32>
    %22 = vector.multi_reduction <add>, %21, %cst_8 [1] : vector<64x64xf32> to vector<64xf32>
    %23 = vector.shape_cast %22 : vector<64xf32> to vector<64x1xf32>
    %cst_9 = arith.constant 1.000000e-24 : f32
    %24 = vector.broadcast %cst_9 : f32 to vector<64x1xf32>
    %25 = arith.maximumf %23, %24 : vector<64x1xf32>
    %26 = math.rsqrt %25 : vector<64x1xf32>
    %27 = vector.broadcast %26 : vector<64x1xf32> to vector<64x64xf32>
    %28 = arith.mulf %20, %27 : vector<64x64xf32>
    %c0_10 = arith.constant 0 : index
    %c0_11 = arith.constant 0 : index
    %29 = vector.load %arg4[%c0_10, %c0_11] : memref<64x64xf32, #tpu.memory_space<vmem>>, vector<64x64xf32>
    tpu.vector_store %arg4[%c0_10, %c0_11], %28 {strides = array<i32>} : memref<64x64xf32, #tpu.memory_space<vmem>>, vector<64x64xf32>,
    return
  }
  func.func @transform_0(%arg0: i32) -> (i32, i32) {
    %c0_i32 = arith.constant 0 : i32
    %c0_i32_0 = arith.constant 0 : i32
    return %arg0, %c0_i32 : i32, i32
  }
  func.func @transform_1(%arg0: i32) -> (i32, i32) {
    %c0_i32 = arith.constant 0 : i32
    %c0_i32_0 = arith.constant 0 : i32
    return %arg0, %c0_i32 : i32, i32
  }
  func.func @transform_2(%arg0: i32) -> (i32, i32) {
    %c0_i32 = arith.constant 0 : i32
    %c0_i32_0 = arith.constant 0 : i32
    return %arg0, %c0_i32 : i32, i32
  }
  func.func @transform_3(%arg0: i32) -> (i32, i32) {
    %c0_i32 = arith.constant 0 : i32
    %c0_i32_0 = arith.constant 0 : i32
    return %arg0, %c0_i32 : i32, i32
  }
}

</mosaic_0001>

<bundles_post_ra>
// kernel: spkbgat_forward.7
= control target key start
LH: loop header
LB: loop body
LE: loop exit
PB: predicated region body
PF: predicated region fallthrough
CT: control target
= control target key end

     0   :  { %vm24_vm0 = vcmask 261120   ;;  %s311_s0 = inlined_call_operand.vmem [shape: f32[64,32], index: 0, kind: input, shape index: {}]   ;;  %s312_s1 = inlined_call_operand.vmem [shape: f32[64,32], index: 1, kind: output, shape index: {}]  }
   0x1   :  { %v186_v0 = vld [vmem:[%s311_s0 + $0x20] sm:$0xff]  ;;  %v191_v1 = vld [vmem:[%s311_s0 + $0x10] sm:$0xff]  ;;  %v207_v6 = vld [vmem:[%s311_s0 + $0x28] sm:$0xff] }
   0x2   :  { %v196_v2 = vld [vmem:[%s311_s0] sm:$0xff]  ;;  %v20_v3 = vmul.f32 %v186_v0, %v186_v0  ;;  %v18_v4 = vmul.f32 %v191_v1, %v191_v1  ;;  %v212_v7 = vld [vmem:[%s311_s0 + $0x18] sm:$0xff]  ;;  %v220_v11 = vld [vmem:[%s311_s0 + $0x8] sm:$0xff]  ;;  %v21_v12 = vmul.f32 %v207_v6, %v207_v6 }
   0x3   :  { %v16_v5 = vmul.f32 %v196_v2, %v196_v2  ;;  %v19_v13 = vmul.f32 %v212_v7, %v212_v7  ;;  %v17_v14 = vmul.f32 %v220_v11, %v220_v11  ;;  %v234_v18 = vld [vmem:[%s311_s0 + $0x38] sm:$0xff]  ;;  %v239_v19 = vld [vmem:[%s311_s0 + $0x30] sm:$0xff] }
   0x4   :  { %v37_v8 = vsel %vm24_vm0, %v20_v3, 0.0  ;;  %v31_v9 = vsel %vm24_vm0, %v18_v4, 0.0  ;;  %v40_v15 = vsel %vm24_vm0, %v21_v12, 0.0  ;;  %v23_v20 = vmul.f32 %v234_v18, %v234_v18 }
   0x5   :  { %v25_v10 = vsel %vm24_vm0, %v16_v5, 0.0  ;;  %38 = vadd.xlane.f32.xlu2 %v37_v8  ;;  %32 = vadd.xlane.f32.xlu1 %v31_v9  ;;  %v34_v16 = vsel %vm24_vm0, %v19_v13, 0.0  ;;  %v28_v17 = vsel %vm24_vm0, %v17_v14, 0.0  ;;  %v22_v21 = vmul.f32 %v239_v19, %v239_v19 }
   0x6   :  { %26 = vadd.xlane.f32.xlu0 %v25_v10  ;;  %v46_v22 = vsel %vm24_vm0, %v23_v20, 0.0 }
   0x7   :  { %v43_v23 = vsel %vm24_vm0, %v22_v21, 0.0 }
   0xd   :  { %41 = vadd.xlane.f32.xlu2 %v40_v15  ;;  %35 = vadd.xlane.f32.xlu1 %v34_v16 }
   0xe   :  { %29 = vadd.xlane.f32.xlu0 %v28_v17 }
  0x15   :  { %47 = vadd.xlane.f32.xlu1 %v46_v22 }
  0x16   :  { %44 = vadd.xlane.f32.xlu0 %v43_v23 }
  0x78   :  { %v39_v24 = vpop.xlane.xlu2 %38  ;;  %v33_v25 = vpop.xlane.xlu1 %32 }
  0x79   :  { %v53_v26 = vmax.f32 %v39_v24, 1e-24  ;;  %v51_v27 = vmax.f32 %v33_v25, 1e-24  ;;  %v27_v28 = vpop.xlane.xlu0 %26 }
  0x7a   :  { %v49_v29 = vmax.f32 %v27_v28, 1e-24 }
  0x7b   :  { %157 = vrsqrt.f32 %v53_v26  ;;  %vm103_vm1 = vweird.f32 %v53_v26  ;;  %vm83_vm3 = vweird.f32 %v51_v27 }
  0x7c   :  { %159 = vrsqrt.f32 %v51_v27  ;;  %vm63_vm7 = vweird.f32 %v49_v29 }
  0x7d   :  { %161 = vrsqrt.f32 %v49_v29 }
  0x80   :  { %v42_v30 = vpop.xlane.xlu2 %41  ;;  %v36_v31 = vpop.xlane.xlu1 %35 }
  0x81   :  { %v158_v32 = vpop.eup %157  ;;  %v247_v33 = vmax.f32 %v42_v30, 1e-24  ;;  %v249_v34 = vmax.f32 %v36_v31, 1e-24  ;;  %v30_v35 = vpop.xlane.xlu0 %29 }
  0x82   :  { %v160_v36 = vpop.eup %159  ;;  %v98_v37 = vmul.f32 %v158_v32, %v53_v26  ;;  %v251_v38 = vmax.f32 %v30_v35, 1e-24  ;;  %vm104_vm2 = vweird.f32 %v158_v32 }
  0x83   :  { %v162_v39 = vpop.eup %161  ;;  %v78_v40 = vmul.f32 %v160_v36, %v51_v27  ;;  %163 = vrsqrt.f32 %v247_v33  ;;  %vm84_vm4 = vweird.f32 %v160_v36  ;;  %vm105_vm6 = vmor %vm103_vm1, %vm104_vm2  ;;  %vm113_vm10 = vweird.f32 %v247_v33 }
  0x84   :  { %v99_v41 = vmul.f32 %v158_v32, %v98_v37  ;;  %v58_v42 = vmul.f32 %v162_v39, %v49_v29  ;;  %165 = vrsqrt.f32 %v249_v34  ;;  %vm64_vm5 = vweird.f32 %v162_v39  ;;  %vm85_vm8 = vmor %vm83_vm3, %vm84_vm4 }
  0x85   :  { %v79_v43 = vmul.f32 %v160_v36, %v78_v40  ;;  %167 = vrsqrt.f32 %v251_v38  ;;  %vm65_vm9 = vmor %vm63_vm7, %vm64_vm5  ;;  %vm93_vm15 = vweird.f32 %v249_v34  ;;  %vm73_vm2 = vweird.f32 %v251_v38 }
  0x86   :  { %v100_v44 = vmul.f32 0.5, %v99_v41  ;;  %v59_v45 = vmul.f32 %v162_v39, %v58_v42 }
  0x87   :  { %v80_v46 = vmul.f32 0.5, %v79_v43 }
  0x88   :  { %v101_v47 = vsub.f32 1.5, %v100_v44  ;;  %v60_v48 = vmul.f32 0.5, %v59_v45  ;;  %v48_v49 = vpop.xlane.xlu1 %47 }
  0x89   :  { %v164_v50 = vpop.eup %163  ;;  %v81_v51 = vsub.f32 1.5, %v80_v46  ;;  %v256_v52 = vmax.f32 %v48_v49, 1e-24  ;;  %v45_v3 = vpop.xlane.xlu0 %44 }
  0x8a   :  { %v166_v53 = vpop.eup %165  ;;  %v102_v54 = vmul.f32 %v158_v32, %v101_v47  ;;  %v61_v55 = vsub.f32 1.5, %v60_v48  ;;  %v108_v56 = vmul.f32 %v164_v50, %v247_v33  ;;  %v55_v16 = vmax.f32 %v45_v3, 1e-24 }
  0x8b   :  { %v168_v57 = vpop.eup %167  ;;  %v82_v58 = vmul.f32 %v160_v36, %v81_v51  ;;  %v88_v59 = vmul.f32 %v166_v53, %v249_v34  ;;  %169 = vrsqrt.f32 %v256_v52  ;;  %vm114_vm11 = vweird.f32 %v164_v50 }
  0x8c   :  { %v106_v60 = vsel %vm105_vm6, %v158_v32, %v102_v54  ;;  %v62_v61 = vmul.f32 %v162_v39, %v61_v55  ;;  %v109_v62 = vmul.f32 %v164_v50, %v108_v56  ;;  %v68_v63 = vmul.f32 %v168_v57, %v251_v38  ;;  %vm115_vm14 = vmor %vm113_vm10, %vm114_vm11 }
  0x8d   :  { %v141_v4 = vmul.f32 %v106_v60, %v186_v0  ;;  %v86_v5 = vsel %vm85_vm8, %v160_v36, %v82_v58  ;;  %v89_v8 = vmul.f32 %v166_v53, %v88_v59  ;;  %vm94_vm12 = vweird.f32 %v166_v53 }
  0x8e   :  { %v139_v9 = vmul.f32 %v86_v5, %v191_v1  ;;  %v66_v10 = vsel %vm65_vm9, %v162_v39, %v62_v61  ;;  %v110_v12 = vmul.f32 0.5, %v109_v62  ;;  %v69_v13 = vmul.f32 %v168_v57, %v68_v63  ;;  %vm95_vm1 = vmor %vm93_vm15, %vm94_vm12 }
  0x8f   :  { %149 = vst.msk [vmem:[%s312_s1 + $0x20] sm:$0xff] %vm24_vm0, %v141_v4  ;;  %v137_v14 = vmul.f32 %v66_v10, %v196_v2  ;;  %v90_v15 = vmul.f32 0.5, %v89_v8  ;;  %171 = vrsqrt.f32 %v55_v16  ;;  %vm74_vm13 = vweird.f32 %v168_v57 }
  0x90   :  { %147 = vst.msk [vmem:[%s312_s1 + $0x10] sm:$0xff] %vm24_vm0, %v139_v9  ;;  %v111_v0 = vsub.f32 1.5, %v110_v12  ;;  %v70_v1 = vmul.f32 0.5, %v69_v13  ;;  %vm75_vm3 = vmor %vm73_vm2, %vm74_vm13  ;;  %vm133_vm5 = vweird.f32 %v256_v52  ;;  %vm123_vm8 = vweird.f32 %v55_v16 }
  0x91   :  { %v170_v17 = vpop.eup %169  ;;  %145 = vst.msk [vmem:[%s312_s1] sm:$0xff] %vm24_vm0, %v137_v14  ;;  %v91_v20 = vsub.f32 1.5, %v90_v15 }
  0x92   :  { %v112_v2 = vmul.f32 %v164_v50, %v111_v0  ;;  %v71_v21 = vsub.f32 1.5, %v70_v1  ;;  %v128_v22 = vmul.f32 %v170_v17, %v256_v52  ;;  %vm134_vm4 = vweird.f32 %v170_v17 }
  0x93   :  { %v92_v23 = vmul.f32 %v166_v53, %v91_v20  ;;  %vm135_vm6 = vmor %vm133_vm5, %vm134_vm4 }
  0x94   :  { %v116_v24 = vsel %vm115_vm14, %v164_v50, %v112_v2  ;;  %v72_v25 = vmul.f32 %v168_v57, %v71_v21  ;;  %v129_v26 = vmul.f32 %v170_v17, %v128_v22 }
  0x95   :  { %v142_v27 = vmul.f32 %v116_v24, %v207_v6  ;;  %v96_v28 = vsel %vm95_vm1, %v166_v53, %v92_v23  ;;  %v172_v32 = vpop.eup %171 }
  0x96   :  { %v140_v29 = vmul.f32 %v96_v28, %v212_v7  ;;  %v76_v30 = vsel %vm75_vm3, %v168_v57, %v72_v25  ;;  %v130_v31 = vmul.f32 0.5, %v129_v26  ;;  %v118_v34 = vmul.f32 %v172_v32, %v55_v16 }
  0x97   :  { %150 = vst.msk [vmem:[%s312_s1 + $0x28] sm:$0xff] %vm24_vm0, %v142_v27  ;;  %v138_v33 = vmul.f32 %v76_v30, %v220_v11  ;;  %vm124_vm7 = vweird.f32 %v172_v32 }
  0x98   :  { %148 = vst.msk [vmem:[%s312_s1 + $0x18] sm:$0xff] %vm24_vm0, %v140_v29  ;;  %v131_v6 = vsub.f32 1.5, %v130_v31  ;;  %v119_v35 = vmul.f32 %v172_v32, %v118_v34  ;;  %vm125_vm9 = vmor %vm123_vm8, %vm124_vm7 }
  0x99   :  { %146 = vst.msk [vmem:[%s312_s1 + $0x8] sm:$0xff] %vm24_vm0, %v138_v33 }
  0x9a   :  { %v132_v7 = vmul.f32 %v170_v17, %v131_v6  ;;  %v120_v11 = vmul.f32 0.5, %v119_v35 }
  0x9c   :  { %v136_v36 = vsel %vm135_vm6, %v170_v17, %v132_v7  ;;  %v121_v38 = vsub.f32 1.5, %v120_v11 }
  0x9d   :  { %v144_v37 = vmul.f32 %v136_v36, %v234_v18 }
  0x9e   :  { %v122_v39 = vmul.f32 %v172_v32, %v121_v38 }
  0x9f   :  { %152 = vst.msk [vmem:[%s312_s1 + $0x38] sm:$0xff] %vm24_vm0, %v144_v37 }
  0xa0   :  { %v126_v40 = vsel %vm125_vm9, %v172_v32, %v122_v39 }
  0xa1   :  { %v143_v41 = vmul.f32 %v126_v40, %v239_v19 }
  0xa3   :  { %151 = vst.msk [vmem:[%s312_s1 + $0x30] sm:$0xff] %vm24_vm0, %v143_v41 }

// kernel: spkbgat_forward.8
= control target key start
LH: loop header
LB: loop body
LE: loop exit
PB: predicated region body
PF: predicated region fallthrough
CT: control target
= control target key end

     0   :  { %vm80_vm0 = vcmask 261120   ;;  %v608_v18 = vmov 64   ;;  %v609_v20 = vmov 65   ;;  %vm432_vm9 = vcmask 523264   ;;  %s876_s4 = inlined_call_operand.vmem [shape: bf16[32,128], index: 4, kind: input, shape index: {}]   ;;  %s877_s5 = inlined_call_operand.vmem [shape: bf16[32,128], index: 5, kind: input, shape index: {}]   ;;  %s878_s3 = inlined_call_operand.vmem [shape: bf16[32,128], index: 3, kind: input, shape index: {}]   ;;  %s879_s1 = inlined_call_operand.vmem [shape: bf16[64,32], index: 1, kind: input, shape index: {}]   ;;  %s880_s2 = inlined_call_operand.vmem [shape: bf16[64,32], index: 2, kind: input, shape index: {}]   ;;  %s881_s0 = inlined_call_operand.vmem [shape: bf16[64,32], index: 0, kind: input, shape index: {}]   ;;  %s882_s6 = inlined_call_operand.vmem [shape: f32[64,128], index: 6, kind: output, shape index: {}]  }
   0x1   :  { %v566_v0 = vld [vmem:[%s876_s4 + $0x8] sm:$0xff]  ;;  %v565_v3 = vld [vmem:[%s876_s4] sm:$0xff]  ;;  %v563_v10 = vld [vmem:[%s879_s1 + $0x10] sm:$0xff]  ;;  %581 = vset.pattern.permute.xlu1 %v608_v18  ;;  %587 = vset.pattern.permute.xlu0 %v608_v18  ;;  %vm441_vm10 = vcmask 531456   ;;  %vm450_vm11 = vcmask 539648  }
   0x2   :  { %v572_v1 = vld [vmem:[%s877_s5 + $0x8] sm:$0xff]  ;;  %99 = vmatpush.bf16.msra.mxu0 %v566_v0  ;;  %573 = vmatpush.bf16.msra.mxu3 %v566_v0  ;;  %v571_v4 = vld [vmem:[%s877_s5] sm:$0xff]  ;;  %v569_v12 = vld [vmem:[%s880_s2 + $0x10] sm:$0xff] }
   0x3   :  { %v560_v2 = vld [vmem:[%s878_s3 + $0x8] sm:$0xff]  ;;  %577 = vmatpush.bf16.msra.mxu2 %v572_v1  ;;  %v559_v5 = vld [vmem:[%s878_s3] sm:$0xff]  ;;  %v557_v13 = vld [vmem:[%s881_s0 + $0x10] sm:$0xff]  ;;  %584 = vset.pattern.permute.xlu2 %v609_v20 }
   0x4   :  { %575 = vmatpush.bf16.msra.mxu1 %v560_v2  ;;  %v561_v6 = vld [vmem:[%s879_s1] sm:$0xff]  ;;  %v562_v7 = vld [vmem:[%s879_s1 + $0x8] sm:$0xff]  ;;  %v564_v14 = vld [vmem:[%s879_s1 + $0x18] sm:$0xff] }
   0x5   :  { %v568_v8 = vld [vmem:[%s880_s2 + $0x8] sm:$0xff]  ;;  %v555_v11 = vld [vmem:[%s881_s0] sm:$0xff]  ;;  %v570_v16 = vld [vmem:[%s880_s2 + $0x18] sm:$0xff] }
   0x6   :  { %100 = vmatpush.bf16.msra.mxu0 %v565_v3  ;;  %574 = vmatpush.bf16.msra.mxu3 %v565_v3  ;;  %v556_v9 = vld [vmem:[%s881_s0 + $0x8] sm:$0xff]  ;;  %v567_v15 = vld [vmem:[%s880_s2] sm:$0xff]  ;;  %v558_v17 = vld [vmem:[%s881_s0 + $0x18] sm:$0xff] }
   0x7   :  { %578 = vmatpush.bf16.msra.mxu2 %v571_v4 }
   0x8   :  { %576 = vmatpush.bf16.msra.mxu1 %v559_v5 }
   0x9   :  { %495 = vmatmul.msk.bf16.vlgmr.msra.gmra.mxu0 %vm80_vm0, %v561_v6  ;;  %496 = vmatmul.msk.bf16.vlgmr.msra.gmra.mxu3 %vm80_vm0, %v562_v7 }
   0xa   :  { %172 = vmatpush.bf16.msrb.mxu0 %v560_v2  ;;  %552 = vmatmul.msk.bf16.vlgmr.msra.gmra.mxu2 %vm80_vm0, %v568_v8 }
   0xb   :  { %524 = vmatmul.msk.bf16.vlgmr.msra.gmra.mxu1 %vm80_vm0, %v556_v9 }
   0xe   :  { %173 = vmatpush.bf16.msrb.mxu0 %v559_v5 }
  0x12   :  { %257 = vmatpush.bf16.msra.mxu0 %v572_v1 }
  0x16   :  { %258 = vmatpush.bf16.msra.mxu0 %v571_v4 }
  0x19   :  { %497 = vmatmul.msk.bf16.gmra.mxu3 %vm80_vm0, %v563_v10  ;;  %523 = vmatmul.msk.bf16.vlgmr.msrb.gmra.mxu0 %vm80_vm0, %v555_v11 }
  0x1a   :  { %553 = vmatmul.msk.bf16.gmra.mxu2 %vm80_vm0, %v569_v12 }
  0x1b   :  { %525 = vmatmul.msk.bf16.gmra.mxu1 %vm80_vm0, %v557_v13 }
  0x29   :  { %498 = vmatmul.msk.bf16.gmra.mxu3 %vm80_vm0, %v564_v14  ;;  %551 = vmatmul.msk.bf16.vlgmr.msra.gmra.mxu0 %vm80_vm0, %v567_v15 }
  0x2a   :  { %554 = vmatmul.msk.bf16.gmra.mxu2 %vm80_vm0, %v570_v16 }
  0x2b   :  { %526 = vmatmul.msk.bf16.gmra.mxu1 %vm80_vm0, %v558_v17 }
  0x86   :  { %v102_v19 = vpop.f32.mrf.mxu0 }
  0x88   :  { %v180_v21 = vpop.f32.mrf.mxu1 }
  0x8c   :  { %v107_v22 = vpop.f32.mrf.mxu3 }
  0x8d   :  { %v181_v23 = vadd.f32 %v180_v21, %v107_v22  ;;  %v265_v24 = vpop.f32.mrf.mxu2 }
  0x8e   :  { %v104_v25 = vpop.f32.mrf.mxu0 }
  0x8f   :  { %v714_v26 = vadd.f32 %v265_v24, %v181_v23 }
  0x90   :  { %v182_v27 = vpop.f32.mrf.mxu1 }
  0x91   :  { %vm290_vm1 = vcmp.gt.f32.partialorder %v714_v26, 0.0  ;;  %v298_v28 = vmul.f32 0.2, %v714_v26 }
  0x93   :  { %v306_v29 = vsel %vm290_vm1, %v714_v26, %v298_v28 }
  0x94   :  { %v314_v30 = vsub.f32 0.0, %v306_v29  ;;  %v109_v31 = vpop.f32.mrf.mxu3 }
  0x95   :  { %v183_v32 = vadd.f32 %v182_v27, %v109_v31  ;;  %v267_v33 = vpop.f32.mrf.mxu2 }
  0x96   :  { %v324_v34 = vmul.f32 1.442695, %v314_v30  ;;  %v175_v35 = vpop.f32.mrf.mxu0 }
  0x97   :  { %v719_v36 = vadd.f32 %v267_v33, %v183_v32  ;;  %v176_v53 = vadd.f32 %v175_v35, %v102_v19 }
  0x98   :  { %592 = vpow2.f32 %v324_v34  ;;  %v185_v37 = vpop.f32.mrf.mxu1 }
  0x99   :  { %vm291_vm2 = vcmp.gt.f32.partialorder %v719_v36, 0.0  ;;  %v299_v38 = vmul.f32 0.2, %v719_v36 }
  0x9b   :  { %v307_v39 = vsel %vm291_vm2, %v719_v36, %v299_v38 }
  0x9c   :  { %v315_v40 = vsub.f32 0.0, %v307_v39  ;;  %v112_v41 = vpop.f32.mrf.mxu3 }
  0x9d   :  { %v186_v42 = vadd.f32 %v185_v37, %v112_v41  ;;  %v270_v43 = vpop.f32.mrf.mxu2 }
  0x9e   :  { %v724_v44 = vpop.eup %592  ;;  %v326_v45 = vmul.f32 1.442695, %v315_v40  ;;  %v177_v46 = vpop.f32.mrf.mxu0 }
  0x9f   :  { %v726_v47 = vadd.f32 %v270_v43, %v186_v42  ;;  %348 = vperm.xlu1 %581, %v724_v44   ;;  %v178_v5 = vadd.f32 %v177_v46, %v104_v25 }
  0xa0   :  { %594 = vpow2.f32 %v326_v45  ;;  %v187_v48 = vpop.f32.mrf.mxu1 }
  0xa1   :  { %vm292_vm3 = vcmp.gt.f32.partialorder %v726_v47, 0.0  ;;  %v300_v49 = vmul.f32 0.2, %v726_v47 }
  0xa3   :  { %v308_v50 = vsel %vm292_vm3, %v726_v47, %v300_v49 }
  0xa4   :  { %v316_v51 = vsub.f32 0.0, %v308_v50  ;;  %v114_v52 = vpop.f32.mrf.mxu3 }
  0xa5   :  { %v188_v54 = vadd.f32 %v187_v48, %v114_v52  ;;  %v272_v55 = vpop.f32.mrf.mxu2 }
  0xa6   :  { %v732_v56 = vpop.eup %594  ;;  %v328_v57 = vmul.f32 1.442695, %v316_v51  ;;  %v260_v58 = vpop.f32.mrf.mxu0 }
  0xa7   :  { %v734_v59 = vadd.f32 %v260_v58, %v176_v53  ;;  %v736_v60 = vadd.f32 %v272_v55, %v188_v54  ;;  %397 = vperm.xlu2 %584, %v732_v56   ;;  %582 = vset.pattern.permute.xlu1 %v609_v20 }
  0xa8   :  { %596 = vpow2.f32 %v328_v57  ;;  %393 = vperm.xlu1 %582, %v724_v44   ;;  %v190_v61 = vpop.f32.mrf.mxu1 }
  0xa9   :  { %vm288_vm4 = vcmp.gt.f32.partialorder %v734_v59, 0.0  ;;  %v296_v62 = vmul.f32 0.2, %v734_v59  ;;  %vm293_vm5 = vcmp.gt.f32.partialorder %v736_v60, 0.0  ;;  %v301_v63 = vmul.f32 0.2, %v736_v60 }
  0xab   :  { %v304_v0 = vsel %vm288_vm4, %v734_v59, %v296_v62  ;;  %v309_v1 = vsel %vm293_vm5, %v736_v60, %v301_v63 }
  0xac   :  { %v312_v2 = vsub.f32 0.0, %v304_v0  ;;  %v317_v3 = vsub.f32 0.0, %v309_v1  ;;  %v117_v4 = vpop.f32.mrf.mxu3 }
  0xad   :  { %v191_v6 = vadd.f32 %v190_v61, %v117_v4  ;;  %v275_v7 = vpop.f32.mrf.mxu2 }
  0xae   :  { %v747_v8 = vpop.eup %596  ;;  %v320_v9 = vmul.f32 1.442695, %v312_v2  ;;  %v330_v10 = vmul.f32 1.442695, %v317_v3  ;;  %v262_v11 = vpop.f32.mrf.mxu0 }
  0xaf   :  { %v749_v12 = vadd.f32 %v262_v11, %v178_v5  ;;  %v751_v13 = vadd.f32 %v275_v7, %v191_v6  ;;  %585 = vset.pattern.permute.xlu2 %v608_v18 }
  0xb0   :  { %598 = vpow2.f32 %v320_v9  ;;  %358 = vperm.xlu2 %585, %v747_v8   ;;  %583 = vset.pattern.permute.xlu1 %v608_v18  ;;  %v192_v16 = vpop.f32.mrf.mxu1 }
  0xb1   :  { %600 = vpow2.f32 %v330_v10  ;;  %vm289_vm6 = vcmp.gt.f32.partialorder %v749_v12, 0.0  ;;  %v297_v14 = vmul.f32 0.2, %v749_v12  ;;  %vm294_vm7 = vcmp.gt.f32.partialorder %v751_v13, 0.0  ;;  %353 = vperm.xlu1 %583, %v732_v56  }
  0xb2   :  { %v302_v15 = vmul.f32 0.2, %v751_v13 }
  0xb3   :  { %v305_v17 = vsel %vm289_vm6, %v749_v12, %v297_v14 }
  0xb4   :  { %v313_v19 = vsub.f32 0.0, %v305_v17  ;;  %v310_v21 = vsel %vm294_vm7, %v751_v13, %v302_v15  ;;  %v119_v22 = vpop.f32.mrf.mxu3 }
  0xb5   :  { %v193_v23 = vadd.f32 %v192_v16, %v119_v22  ;;  %v277_v24 = vpop.f32.mrf.mxu2  ;;  %v318_v29 = vsub.f32 0.0, %v310_v21 }
  0xb6   :  { %v763_v25 = vpop.eup %598  ;;  %v322_v27 = vmul.f32 1.442695, %v313_v19 }
  0xb7   :  { %v601_v28 = vpop.eup %600  ;;  %v765_v30 = vadd.f32 %v277_v24, %v193_v23  ;;  %338 = vperm.xlu0 %587, %v763_v25   ;;  %v332_v32 = vmul.f32 1.442695, %v318_v29 }
  0xb8   :  { %602 = vpow2.f32 %v322_v27  ;;  %363 = vperm.xlu2 %585, %v601_v28  }
  0xb9   :  { %vm295_vm8 = vcmp.gt.f32.partialorder %v765_v30, 0.0  ;;  %v303_v31 = vmul.f32 0.2, %v765_v30  ;;  %586 = vset.pattern.permute.xlu1 %v609_v20  ;;  %604 = vpow2.f32 %v332_v32 }
  0xba   :  { %401 = vperm.xlu1 %586, %v747_v8  }
  0xbb   :  { %v311_v33 = vsel %vm295_vm8, %v765_v30, %v303_v31 }
  0xbc   :  { %v319_v34 = vsub.f32 0.0, %v311_v33 }
  0xbe   :  { %v773_v35 = vpop.eup %602  ;;  %v334_v37 = vmul.f32 1.442695, %v319_v34 }
  0xbf   :  { %343 = vperm.xlu0 %587, %v773_v35   ;;  %v779_v38 = vpop.eup %604 }
  0xc0   :  { %606 = vpow2.f32 %v334_v37  ;;  %588 = vset.pattern.permute.xlu2 %v609_v20 }
  0xc1   :  { %385 = vperm.xlu2 %588, %v763_v25  }
  0xc2   :  { %590 = vset.pattern.permute.xlu1 %v608_v18 }
  0xc6   :  { %v781_v39 = vpop.eup %606 }
  0xc7   :  { %373 = vperm.xlu1 %590, %v781_v39   ;;  %368 = vperm.xlu0 %587, %v779_v38  }
  0xc9   :  { %405 = vperm.xlu2 %588, %v601_v28  }
  0xcf   :  { %591 = vset.pattern.permute.xlu1 %v609_v20  ;;  %589 = vset.pattern.permute.xlu0 %v609_v20 }
  0xd0   :  { %413 = vperm.xlu1 %591, %v781_v39   ;;  %389 = vperm.xlu0 %589, %v773_v35  }
  0xd8   :  { %409 = vperm.xlu0 %589, %v779_v38  }
 0x101   :  { %v398_v18 = vpop.permute.xlu2 %397 }
 0x10a   :  { %v359_v40 = vpop.permute.xlu2 %358 }
 0x10b   :  { %v380_v5 = vmul.f32 %v359_v40, %v726_v47 }
 0x111   :  { %v349_v41 = vpop.permute.xlu1 %348 }
 0x112   :  { %v364_v42 = vpop.permute.xlu2 %363  ;;  %v378_v45 = vmul.f32 %v349_v41, %v714_v26 }
 0x113   :  { %v381_v54 = vmul.f32 %v364_v42, %v736_v60 }
 0x11a   :  { %v394_v43 = vpop.permute.xlu1 %393 }
 0x11b   :  { %v418_v46 = vmul.f32 %v394_v43, %v714_v26  ;;  %v386_v48 = vpop.permute.xlu2 %385  ;;  %v419_v26 = vmul.f32 %v398_v18, %v719_v36 }
 0x11d   :  { %v426_v20 = vsel %vm80_vm0, %v378_v45, %v418_v46 }
 0x11e   :  { %v435_v49 = vsel %vm432_vm9, %v426_v20, %v724_v44 }
 0x11f   :  { %v444_v50 = vsel %vm441_vm10, %v435_v49, %v724_v44 }
 0x120   :  { %v453_v51 = vsel %vm450_vm11, %v444_v50, 0.0 }
 0x121   :  { %461 = vst [vmem:[%s882_s6 + $0x10] sm:$0xff] %v453_v51 }
 0x123   :  { %v354_v52 = vpop.permute.xlu1 %353  ;;  %v406_v53 = vpop.permute.xlu2 %405 }
 0x124   :  { %v379_v55 = vmul.f32 %v354_v52, %v719_v36  ;;  %v421_v57 = vmul.f32 %v406_v53, %v736_v60  ;;  %v416_v60 = vmul.f32 %v386_v48, %v734_v59 }
 0x126   :  { %v427_v58 = vsel %vm80_vm0, %v379_v55, %v419_v26  ;;  %v429_v44 = vsel %vm80_vm0, %v381_v54, %v421_v57 }
 0x127   :  { %v436_v61 = vsel %vm432_vm9, %v427_v58, %v732_v56  ;;  %v438_v62 = vsel %vm432_vm9, %v429_v44, %v601_v28 }
 0x128   :  { %v445_v63 = vsel %vm441_vm10, %v436_v61, %v732_v56  ;;  %v447_v0 = vsel %vm441_vm10, %v438_v62, %v601_v28 }
 0x129   :  { %v454_v1 = vsel %vm450_vm11, %v445_v63, 0.0  ;;  %v456_v36 = vsel %vm450_vm11, %v447_v0, 0.0  ;;  %v339_v2 = vpop.permute.xlu0 %338 }
 0x12a   :  { %462 = vst [vmem:[%s882_s6 + $0x18] sm:$0xff] %v454_v1  ;;  %v376_v3 = vmul.f32 %v339_v2, %v734_v59 }
 0x12b   :  { %464 = vst [vmem:[%s882_s6 + $0x28] sm:$0xff] %v456_v36 }
 0x12c   :  { %v424_v56 = vsel %vm80_vm0, %v376_v3, %v416_v60  ;;  %v402_v4 = vpop.permute.xlu1 %401 }
 0x12d   :  { %v433_v6 = vsel %vm432_vm9, %v424_v56, %v763_v25  ;;  %v420_v7 = vmul.f32 %v402_v4, %v726_v47 }
 0x12e   :  { %v442_v9 = vsel %vm441_vm10, %v433_v6, %v763_v25 }
 0x12f   :  { %v451_v10 = vsel %vm450_vm11, %v442_v9, 0.0  ;;  %v428_v59 = vsel %vm80_vm0, %v380_v5, %v420_v7 }
 0x130   :  { %459 = vst [vmem:[%s882_s6] sm:$0xff] %v451_v10  ;;  %v437_v11 = vsel %vm432_vm9, %v428_v59, %v747_v8 }
 0x131   :  { %v446_v14 = vsel %vm441_vm10, %v437_v11, %v747_v8  ;;  %v344_v15 = vpop.permute.xlu0 %343 }
 0x132   :  { %v455_v47 = vsel %vm450_vm11, %v446_v14, 0.0  ;;  %v377_v22 = vmul.f32 %v344_v15, %v749_v12 }
 0x133   :  { %463 = vst [vmem:[%s882_s6 + $0x20] sm:$0xff] %v455_v47 }
 0x139   :  { %v374_v16 = vpop.permute.xlu1 %373  ;;  %v369_v17 = vpop.permute.xlu0 %368 }
 0x13a   :  { %v383_v23 = vmul.f32 %v374_v16, %v765_v30  ;;  %v382_v34 = vmul.f32 %v369_v17, %v751_v13 }
 0x142   :  { %v414_v19 = vpop.permute.xlu1 %413  ;;  %v390_v21 = vpop.permute.xlu0 %389 }
 0x143   :  { %v423_v24 = vmul.f32 %v414_v19, %v765_v30  ;;  %v417_v25 = vmul.f32 %v390_v21, %v749_v12 }
 0x145   :  { %v431_v8 = vsel %vm80_vm0, %v383_v23, %v423_v24  ;;  %v425_v27 = vsel %vm80_vm0, %v377_v22, %v417_v25 }
 0x146   :  { %v440_v28 = vsel %vm432_vm9, %v431_v8, %v781_v39  ;;  %v434_v29 = vsel %vm432_vm9, %v425_v27, %v773_v35 }
 0x147   :  { %v449_v31 = vsel %vm441_vm10, %v440_v28, %v781_v39  ;;  %v443_v32 = vsel %vm441_vm10, %v434_v29, %v773_v35 }
 0x148   :  { %v458_v30 = vsel %vm450_vm11, %v449_v31, 0.0  ;;  %v452_v12 = vsel %vm450_vm11, %v443_v32, 0.0 }
 0x149   :  { %466 = vst [vmem:[%s882_s6 + $0x38] sm:$0xff] %v458_v30 }
 0x14a   :  { %460 = vst [vmem:[%s882_s6 + $0x8] sm:$0xff] %v452_v12  ;;  %v410_v33 = vpop.permute.xlu0 %409 }
 0x14b   :  { %v422_v37 = vmul.f32 %v410_v33, %v751_v13 }
 0x14d   :  { %v430_v39 = vsel %vm80_vm0, %v382_v34, %v422_v37 }
 0x14e   :  { %v439_v35 = vsel %vm432_vm9, %v430_v39, %v779_v38 }
 0x14f   :  { %v448_v18 = vsel %vm441_vm10, %v439_v35, %v779_v38 }
 0x150   :  { %v457_v40 = vsel %vm450_vm11, %v448_v18, 0.0 }
 0x151   :  { %465 = vst [vmem:[%s882_s6 + $0x30] sm:$0xff] %v457_v40 }

// kernel: spkbgat_forward.9
= control target key start
LH: loop header
LB: loop body
LE: loop exit
PB: predicated region body
PF: predicated region fallthrough
CT: control target
= control target key end

     0   :  { %v302_v0 = vmov 64   ;;  %v303_v25 = vmov 65   ;;  %vm208_vm9 = vcmask 261120   ;;  %vm217_vm10 = vcmask 523264   ;;  %s429_s0 = inlined_call_operand.vmem [shape: f32[64,128], index: 0, kind: input, shape index: {}]   ;;  %s430_s1 = inlined_call_operand.vmem [shape: f32[64,64], index: 1, kind: output, shape index: {}]  }
   0x1   :  { %250 = vset.pattern.permute.xlu2 %v302_v0  ;;  %249 = vset.pattern.permute.xlu1 %v302_v0  ;;  %v317_v1 = vld [vmem:[%s429_s0 + $0x20] sm:$0xff]  ;;  %v322_v2 = vld [vmem:[%s429_s0 + $0x10] sm:$0xff]  ;;  %v335_v4 = vld [vmem:[%s429_s0 + $0x28] sm:$0xff] }
   0x2   :  { %v327_v3 = vld [vmem:[%s429_s0] sm:$0xff]  ;;  %248 = vset.pattern.permute.xlu0 %v302_v0  ;;  %vm20_vm0 = vcmp.eq.f32.partialorder %v317_v1, 0.0  ;;  %vm18_vm1 = vcmp.eq.f32.partialorder %v322_v2, 0.0  ;;  %v340_v5 = vld [vmem:[%s429_s0 + $0x18] sm:$0xff]  ;;  %v345_v6 = vld [vmem:[%s429_s0 + $0x8] sm:$0xff]  ;;  %vm21_vm3 = vcmp.eq.f32.partialorder %v335_v4, 0.0 }
   0x3   :  { %vm16_vm2 = vcmp.eq.f32.partialorder %v327_v3, 0.0  ;;  %v28_v7 = vsel %vm20_vm0, 1e-12, %v317_v1  ;;  %v26_v8 = vsel %vm18_vm1, 1e-12, %v322_v2  ;;  %vm19_vm4 = vcmp.eq.f32.partialorder %v340_v5, 0.0 }
   0x4   :  { %v24_v9 = vsel %vm16_vm2, 1e-12, %v327_v3  ;;  %254 = vrcp.f32 %v28_v7  ;;  %vm17_vm5 = vcmp.eq.f32.partialorder %v345_v6, 0.0  ;;  %v29_v10 = vsel %vm21_vm3, 1e-12, %v335_v4  ;;  %v359_v14 = vld [vmem:[%s429_s0 + $0x38] sm:$0xff] }
   0x5   :  { %256 = vrcp.f32 %v26_v8  ;;  %v27_v11 = vsel %vm19_vm4, 1e-12, %v340_v5  ;;  %v25_v12 = vsel %vm17_vm5, 1e-12, %v345_v6  ;;  %v364_v16 = vld [vmem:[%s429_s0 + $0x30] sm:$0xff]  ;;  %vm23_vm6 = vcmp.eq.f32.partialorder %v359_v14, 0.0 }
   0x6   :  { %258 = vrcp.f32 %v24_v9  ;;  %vm22_vm7 = vcmp.eq.f32.partialorder %v364_v16, 0.0  ;;  %v31_v19 = vsel %vm23_vm6, 1e-12, %v359_v14 }
   0x7   :  { %260 = vrcp.f32 %v29_v10  ;;  %v30_v21 = vsel %vm22_vm7, 1e-12, %v364_v16 }
   0x8   :  { %262 = vrcp.f32 %v27_v11 }
   0x9   :  { %264 = vrcp.f32 %v25_v12 }
   0xa   :  { %v255_v13 = vpop.eup %254  ;;  %266 = vrcp.f32 %v31_v19 }
   0xb   :  { %v257_v15 = vpop.eup %256  ;;  %62 = vperm.xlu2 %250, %v255_v13   ;;  %268 = vrcp.f32 %v30_v21 }
   0xc   :  { %v259_v17 = vpop.eup %258  ;;  %52 = vperm.xlu1 %249, %v257_v15  }
   0xd   :  { %42 = vperm.xlu0 %248, %v259_v17   ;;  %v261_v18 = vpop.eup %260 }
   0xe   :  { %v263_v20 = vpop.eup %262 }
   0xf   :  { %v265_v22 = vpop.eup %264 }
  0x10   :  { %v267_v23 = vpop.eup %266 }
  0x11   :  { %v269_v24 = vpop.eup %268 }
  0x13   :  { %67 = vperm.xlu2 %250, %v261_v18  }
  0x14   :  { %57 = vperm.xlu1 %249, %v263_v20  }
  0x15   :  { %47 = vperm.xlu0 %248, %v265_v22  }
  0x1b   :  { %251 = vset.pattern.permute.xlu2 %v303_v25 }
  0x1c   :  { %77 = vperm.xlu1 %249, %v267_v23   ;;  %129 = vperm.xlu2 %251, %v259_v17  }
  0x1d   :  { %72 = vperm.xlu0 %248, %v269_v24  }
  0x24   :  { %253 = vset.pattern.permute.xlu1 %v303_v25  ;;  %141 = vperm.xlu2 %251, %v263_v20  }
  0x25   :  { %252 = vset.pattern.permute.xlu0 %v303_v25  ;;  %137 = vperm.xlu1 %253, %v257_v15  }
  0x26   :  { %133 = vperm.xlu0 %252, %v265_v22  }
  0x2c   :  { %149 = vperm.xlu2 %251, %v261_v18  }
  0x2d   :  { %145 = vperm.xlu1 %253, %v255_v13  }
  0x2e   :  { %153 = vperm.xlu0 %252, %v269_v24  }
  0x35   :  { %157 = vperm.xlu1 %253, %v267_v23  }
  0x65   :  { %v370_v26 = vpop.permute.xlu2 %62 }
  0x66   :  { %v84_v15 = vmul.f32 %v370_v26, %v317_v1 }
  0x68   :  { %v104_v23 = vmul.f32 1.442695, %v84_v15  ;;  %vm92_vm4 = vcmp.gt.f32.partialorder %v84_v15, 0.0 }
  0x6d   :  { %v68_v27 = vpop.permute.xlu2 %67 }
  0x6e   :  { %v85_v36 = vmul.f32 %v68_v27, %v335_v4 }
  0x70   :  { %v106_v40 = vmul.f32 1.442695, %v85_v36  ;;  %vm93_vm13 = vcmp.gt.f32.partialorder %v85_v36, 0.0 }
  0x76   :  { %v130_v28 = vpop.permute.xlu2 %129 }
  0x77   :  { %v160_v29 = vmul.f32 %v130_v28, %v327_v3 }
  0x79   :  { %v176_v30 = vmul.f32 1.442695, %v160_v29  ;;  %vm168_vm8 = vcmp.gt.f32.partialorder %v160_v29, 0.0 }
  0x7b   :  { %270 = vpow2.f32 %v176_v30 }
  0x7e   :  { %v53_v31 = vpop.permute.xlu1 %52  ;;  %v142_v32 = vpop.permute.xlu2 %141 }
  0x7f   :  { %v43_v33 = vpop.permute.xlu0 %42  ;;  %v163_v34 = vmul.f32 %v142_v32, %v340_v5  ;;  %v82_v59 = vmul.f32 %v53_v31, %v322_v2 }
  0x80   :  { %v80_v35 = vmul.f32 %v43_v33, %v327_v3 }
  0x81   :  { %v182_v37 = vmul.f32 1.442695, %v163_v34  ;;  %v271_v39 = vpop.eup %270  ;;  %vm171_vm12 = vcmp.gt.f32.partialorder %v163_v34, 0.0  ;;  %vm90_vm0 = vcmp.gt.f32.partialorder %v82_v59, 0.0 }
  0x82   :  { %v96_v38 = vmul.f32 1.442695, %v80_v35  ;;  %v238_v43 = vadd.f32 -1.0, %v271_v39  ;;  %vm88_vm11 = vcmp.gt.f32.partialorder %v80_v35, 0.0 }
  0x84   :  { %272 = vpow2.f32 %v96_v38  ;;  %v200_v51 = vsel %vm168_vm8, %v160_v29, %v238_v43 }
  0x85   :  { %274 = vpow2.f32 %v182_v37 }
  0x86   :  { %v58_v41 = vpop.permute.xlu1 %57  ;;  %v150_v42 = vpop.permute.xlu2 %149  ;;  %276 = vpow2.f32 %v106_v40 }
  0x87   :  { %v83_v44 = vmul.f32 %v58_v41, %v340_v5  ;;  %v48_v45 = vpop.permute.xlu0 %47  ;;  %v165_v46 = vmul.f32 %v150_v42, %v335_v4  ;;  %v100_v4 = vmul.f32 1.442695, %v82_v59 }
  0x88   :  { %v81_v61 = vmul.f32 %v48_v45, %v345_v6 }
  0x89   :  { %v102_v47 = vmul.f32 1.442695, %v83_v44  ;;  %v186_v48 = vmul.f32 1.442695, %v165_v46  ;;  %vm91_vm14 = vcmp.gt.f32.partialorder %v83_v44, 0.0  ;;  %vm173_vm15 = vcmp.gt.f32.partialorder %v165_v46, 0.0 }
  0x8a   :  { %v273_v49 = vpop.eup %272  ;;  %v98_v9 = vmul.f32 1.442695, %v81_v61  ;;  %vm89_vm1 = vcmp.gt.f32.partialorder %v81_v61, 0.0 }
  0x8b   :  { %v275_v50 = vpop.eup %274  ;;  %v230_v52 = vadd.f32 -1.0, %v273_v49  ;;  %278 = vpow2.f32 %v102_v47 }
  0x8c   :  { %280 = vpow2.f32 %v186_v48  ;;  %v241_v55 = vadd.f32 -1.0, %v275_v50  ;;  %v277_v57 = vpop.eup %276 }
  0x8d   :  { %v120_v53 = vsel %vm88_vm11, %v80_v35, %v230_v52  ;;  %v235_v62 = vadd.f32 -1.0, %v277_v57  ;;  %282 = vpow2.f32 %v100_v4 }
  0x8e   :  { %v209_v54 = vsel %vm208_vm9, %v120_v53, %v200_v51  ;;  %v78_v56 = vpop.permute.xlu1 %77  ;;  %v203_v63 = vsel %vm171_vm12, %v163_v34, %v241_v55  ;;  %284 = vpow2.f32 %v98_v9 }
  0x8f   :  { %218 = vst.msk [vmem:[%s430_s1] sm:$0xff] %vm217_vm10, %v209_v54  ;;  %v73_v58 = vpop.permute.xlu0 %72  ;;  %v125_v10 = vsel %vm93_vm13, %v85_v36, %v235_v62  ;;  %v87_v28 = vmul.f32 %v78_v56, %v359_v14 }
  0x90   :  { %v86_v19 = vmul.f32 %v73_v58, %v364_v16 }
  0x91   :  { %v279_v60 = vpop.eup %278  ;;  %v110_v37 = vmul.f32 1.442695, %v87_v28  ;;  %vm95_vm8 = vcmp.gt.f32.partialorder %v87_v28, 0.0 }
  0x92   :  { %v233_v0 = vadd.f32 -1.0, %v279_v60  ;;  %v281_v3 = vpop.eup %280  ;;  %v108_v24 = vmul.f32 1.442695, %v86_v19  ;;  %vm94_vm6 = vcmp.gt.f32.partialorder %v86_v19, 0.0 }
  0x93   :  { %v243_v7 = vadd.f32 -1.0, %v281_v3  ;;  %v283_v25 = vpop.eup %282 }
  0x94   :  { %v123_v5 = vsel %vm91_vm14, %v83_v44, %v233_v0  ;;  %v285_v26 = vpop.eup %284  ;;  %v232_v30 = vadd.f32 -1.0, %v283_v25 }
  0x95   :  { %v212_v8 = vsel %vm208_vm9, %v123_v5, %v203_v63  ;;  %v205_v11 = vsel %vm173_vm15, %v165_v46, %v243_v7  ;;  %v231_v32 = vadd.f32 -1.0, %v285_v26 }
  0x96   :  { %221 = vst.msk [vmem:[%s430_s1 + $0x18] sm:$0xff] %vm217_vm10, %v212_v8  ;;  %v214_v12 = vsel %vm208_vm9, %v125_v10, %v205_v11  ;;  %v122_v39 = vsel %vm90_vm0, %v82_v59, %v232_v30 }
  0x97   :  { %v138_v13 = vpop.permute.xlu1 %137  ;;  %223 = vst.msk [vmem:[%s430_s1 + $0x28] sm:$0xff] %vm217_vm10, %v214_v12  ;;  %v121_v41 = vsel %vm89_vm1, %v81_v61, %v231_v32 }
  0x98   :  { %v162_v17 = vmul.f32 %v138_v13, %v322_v2  ;;  %v134_v18 = vpop.permute.xlu0 %133 }
  0x99   :  { %v161_v20 = vmul.f32 %v134_v18, %v345_v6 }
  0x9a   :  { %v180_v21 = vmul.f32 1.442695, %v162_v17  ;;  %vm170_vm2 = vcmp.gt.f32.partialorder %v162_v17, 0.0 }
  0x9b   :  { %v178_v22 = vmul.f32 1.442695, %v161_v20  ;;  %vm169_vm3 = vcmp.gt.f32.partialorder %v161_v20, 0.0 }
  0x9c   :  { %286 = vpow2.f32 %v180_v21 }
  0x9d   :  { %288 = vpow2.f32 %v178_v22 }
  0x9e   :  { %290 = vpow2.f32 %v104_v23 }
  0x9f   :  { %v146_v27 = vpop.permute.xlu1 %145  ;;  %292 = vpow2.f32 %v108_v24 }
  0xa0   :  { %v164_v2 = vmul.f32 %v146_v27, %v317_v1  ;;  %v154_v29 = vpop.permute.xlu0 %153 }
  0xa1   :  { %v166_v31 = vmul.f32 %v154_v29, %v364_v16 }
  0xa2   :  { %v287_v6 = vpop.eup %286  ;;  %v184_v33 = vmul.f32 1.442695, %v164_v2  ;;  %vm172_vm5 = vcmp.gt.f32.partialorder %v164_v2, 0.0 }
  0xa3   :  { %v289_v34 = vpop.eup %288  ;;  %v240_v35 = vadd.f32 -1.0, %v287_v6  ;;  %v188_v36 = vmul.f32 1.442695, %v166_v31  ;;  %vm174_vm7 = vcmp.gt.f32.partialorder %v166_v31, 0.0 }
  0xa4   :  { %v239_v38 = vadd.f32 -1.0, %v289_v34  ;;  %294 = vpow2.f32 %v184_v33  ;;  %v291_v1 = vpop.eup %290 }
  0xa5   :  { %v202_v40 = vsel %vm170_vm2, %v162_v17, %v240_v35  ;;  %296 = vpow2.f32 %v188_v36  ;;  %v293_v43 = vpop.eup %292  ;;  %v234_v47 = vadd.f32 -1.0, %v291_v1 }
  0xa6   :  { %v211_v16 = vsel %vm208_vm9, %v122_v39, %v202_v40  ;;  %v201_v42 = vsel %vm169_vm3, %v161_v20, %v239_v38  ;;  %298 = vpow2.f32 %v110_v37  ;;  %v236_v49 = vadd.f32 -1.0, %v293_v43 }
  0xa7   :  { %220 = vst.msk [vmem:[%s430_s1 + $0x10] sm:$0xff] %vm217_vm10, %v211_v16  ;;  %v210_v44 = vsel %vm208_vm9, %v121_v41, %v201_v42  ;;  %v158_v45 = vpop.permute.xlu1 %157  ;;  %v124_v54 = vsel %vm92_vm4, %v84_v15, %v234_v47 }
  0xa8   :  { %219 = vst.msk [vmem:[%s430_s1 + $0x8] sm:$0xff] %vm217_vm10, %v210_v44  ;;  %v167_v46 = vmul.f32 %v158_v45, %v359_v14  ;;  %v126_v57 = vsel %vm94_vm6, %v86_v19, %v236_v49 }
  0xaa   :  { %v295_v48 = vpop.eup %294  ;;  %v190_v50 = vmul.f32 1.442695, %v167_v46  ;;  %vm175_vm11 = vcmp.gt.f32.partialorder %v167_v46, 0.0 }
  0xab   :  { %v297_v51 = vpop.eup %296  ;;  %v242_v52 = vadd.f32 -1.0, %v295_v48 }
  0xac   :  { %v244_v53 = vadd.f32 -1.0, %v297_v51  ;;  %300 = vpow2.f32 %v190_v50  ;;  %v299_v56 = vpop.eup %298 }
  0xad   :  { %v204_v55 = vsel %vm172_vm5, %v164_v2, %v242_v52  ;;  %v237_v60 = vadd.f32 -1.0, %v299_v56 }
  0xae   :  { %v213_v58 = vsel %vm208_vm9, %v124_v54, %v204_v55  ;;  %v206_v59 = vsel %vm174_vm7, %v166_v31, %v244_v53 }
  0xaf   :  { %222 = vst.msk [vmem:[%s430_s1 + $0x20] sm:$0xff] %vm217_vm10, %v213_v58  ;;  %v215_v14 = vsel %vm208_vm9, %v126_v57, %v206_v59  ;;  %v127_v63 = vsel %vm95_vm8, %v87_v28, %v237_v60 }
  0xb0   :  { %224 = vst.msk [vmem:[%s430_s1 + $0x30] sm:$0xff] %vm217_vm10, %v215_v14 }
  0xb2   :  { %v301_v61 = vpop.eup %300 }
  0xb3   :  { %v245_v62 = vadd.f32 -1.0, %v301_v61 }
  0xb5   :  { %v207_v0 = vsel %vm175_vm11, %v167_v46, %v245_v62 }
  0xb6   :  { %v216_v3 = vsel %vm208_vm9, %v127_v63, %v207_v0 }
  0xb7   :  { %225 = vst.msk [vmem:[%s430_s1 + $0x38] sm:$0xff] %vm217_vm10, %v216_v3 }

// kernel: spkbgat_forward.10
= control target key start
LH: loop header
LB: loop body
LE: loop exit
PB: predicated region body
PF: predicated region fallthrough
CT: control target
= control target key end

     0   :  { %s213_s1 = inlined_call_operand.vmem [shape: bf16[128,128], index: 1, kind: input, shape index: {}]   ;;  %s214_s0 = inlined_call_operand.vmem [shape: bf16[16,128], index: 0, kind: input, shape index: {}]   ;;  %s215_s2 = inlined_call_operand.vmem [shape: f32[16,128], index: 2, kind: output, shape index: {}]  }
   0x1   :  { %v164_v0 = vld [vmem:[%s213_s1 + $0x38] sm:$0xff]  ;;  %v163_v1 = vld [vmem:[%s213_s1 + $0x30] sm:$0xff]  ;;  %v162_v2 = vld [vmem:[%s213_s1 + $0x28] sm:$0xff] }
   0x2   :  { %91 = vmatpush.bf16.msra.mxu0 %v164_v0  ;;  %v161_v3 = vld [vmem:[%s213_s1 + $0x20] sm:$0xff]  ;;  %v160_v4 = vld [vmem:[%s213_s1 + $0x18] sm:$0xff]  ;;  %v159_v5 = vld [vmem:[%s213_s1 + $0x10] sm:$0xff] }
   0x3   :  { %v158_v6 = vld [vmem:[%s213_s1 + $0x8] sm:$0xff]  ;;  %v157_v7 = vld [vmem:[%s213_s1] sm:$0xff] }
   0x4   :  { %v156_v8 = vld [vmem:[%s214_s0] sm:$0xff] }
   0x6   :  { %92 = vmatpush.bf16.msra.mxu0 %v163_v1 }
   0xa   :  { %93 = vmatpush.bf16.msra.mxu0 %v162_v2 }
   0xe   :  { %94 = vmatpush.bf16.msra.mxu0 %v161_v3 }
  0x12   :  { %95 = vmatpush.bf16.msra.mxu0 %v160_v4 }
  0x16   :  { %96 = vmatpush.bf16.msra.mxu0 %v159_v5 }
  0x1a   :  { %97 = vmatpush.bf16.msra.mxu0 %v158_v6 }
  0x1e   :  { %98 = vmatpush.bf16.msra.mxu0 %v157_v7 }
  0x21   :  { %99 = vmatmul.bf16.vlgmr.msra.gmra.mxu0 %v156_v8 }
  0x9e   :  { %v100_v9 = vpop.f32.mrf.mxu0 }
  0x9f   :  { %114 = vst [vmem:[%s215_s2] sm:$0xff] %v100_v9 }
  0xa6   :  { %v102_v10 = vpop.f32.mrf.mxu0 }
  0xa7   :  { %115 = vst [vmem:[%s215_s2 + $0x8] sm:$0xff] %v102_v10 }

// kernel: spkbgat_forward.11
= control target key start
LH: loop header
LB: loop body
LE: loop exit
PB: predicated region body
PF: predicated region fallthrough
CT: control target
= control target key end

     0   :  { %vm100_vm0 = vcmask 523264   ;;  %v625_v24 = vmov 64   ;;  %vm440_vm9 = vcmask 531456   ;;  %s835_s4 = inlined_call_operand.vmem [shape: bf16[64,128], index: 4, kind: input, shape index: {}]   ;;  %s836_s3 = inlined_call_operand.vmem [shape: bf16[64,128], index: 3, kind: input, shape index: {}]   ;;  %s837_s5 = inlined_call_operand.vmem [shape: bf16[64,128], index: 5, kind: input, shape index: {}]   ;;  %s838_s1 = inlined_call_operand.vmem [shape: bf16[64,64], index: 1, kind: input, shape index: {}]   ;;  %s839_s0 = inlined_call_operand.vmem [shape: bf16[64,64], index: 0, kind: input, shape index: {}]   ;;  %s840_s2 = inlined_call_operand.vmem [shape: bf16[64,64], index: 2, kind: input, shape index: {}]   ;;  %s841_s6 = inlined_call_operand.vmem [shape: f32[64,128], index: 6, kind: output, shape index: {}]  }
   0x1   :  { %v584_v0 = vld [vmem:[%s835_s4 + $0x18] sm:$0xff]  ;;  %v583_v3 = vld [vmem:[%s835_s4 + $0x10] sm:$0xff]  ;;  %v582_v6 = vld [vmem:[%s835_s4 + $0x8] sm:$0xff]  ;;  %606 = vset.pattern.permute.xlu1 %v625_v24  ;;  %607 = vset.pattern.permute.xlu2 %v625_v24 }
   0x2   :  { %v576_v1 = vld [vmem:[%s836_s3 + $0x18] sm:$0xff]  ;;  %117 = vmatpush.bf16.msra.mxu0 %v584_v0  ;;  %593 = vmatpush.bf16.msra.mxu3 %v584_v0  ;;  %v575_v4 = vld [vmem:[%s836_s3 + $0x10] sm:$0xff]  ;;  %v574_v7 = vld [vmem:[%s836_s3 + $0x8] sm:$0xff] }
   0x3   :  { %v592_v2 = vld [vmem:[%s837_s5 + $0x18] sm:$0xff]  ;;  %597 = vmatpush.bf16.msra.mxu1 %v576_v1  ;;  %v591_v5 = vld [vmem:[%s837_s5 + $0x10] sm:$0xff]  ;;  %v590_v8 = vld [vmem:[%s837_s5 + $0x8] sm:$0xff]  ;;  %608 = vset.pattern.permute.xlu0 %v625_v24 }
   0x4   :  { %601 = vmatpush.bf16.msra.mxu2 %v592_v2  ;;  %v581_v9 = vld [vmem:[%s835_s4] sm:$0xff]  ;;  %v578_v13 = vld [vmem:[%s838_s1 + $0x8] sm:$0xff]  ;;  %v579_v16 = vld [vmem:[%s838_s1 + $0x10] sm:$0xff] }
   0x5   :  { %v573_v10 = vld [vmem:[%s836_s3] sm:$0xff]  ;;  %v570_v14 = vld [vmem:[%s839_s0 + $0x8] sm:$0xff]  ;;  %v571_v18 = vld [vmem:[%s839_s0 + $0x10] sm:$0xff] }
   0x6   :  { %118 = vmatpush.bf16.msra.mxu0 %v583_v3  ;;  %594 = vmatpush.bf16.msra.mxu3 %v583_v3  ;;  %v589_v11 = vld [vmem:[%s837_s5] sm:$0xff]  ;;  %v586_v15 = vld [vmem:[%s840_s2 + $0x8] sm:$0xff]  ;;  %v587_v19 = vld [vmem:[%s840_s2 + $0x10] sm:$0xff] }
   0x7   :  { %598 = vmatpush.bf16.msra.mxu1 %v575_v4  ;;  %v577_v12 = vld [vmem:[%s838_s1] sm:$0xff]  ;;  %v580_v20 = vld [vmem:[%s838_s1 + $0x18] sm:$0xff] }
   0x8   :  { %602 = vmatpush.bf16.msra.mxu2 %v591_v5  ;;  %v569_v17 = vld [vmem:[%s839_s0] sm:$0xff]  ;;  %v572_v22 = vld [vmem:[%s839_s0 + $0x18] sm:$0xff] }
   0x9   :  { %v585_v21 = vld [vmem:[%s840_s2] sm:$0xff]  ;;  %v588_v23 = vld [vmem:[%s840_s2 + $0x18] sm:$0xff] }
   0xa   :  { %119 = vmatpush.bf16.msra.mxu0 %v582_v6  ;;  %595 = vmatpush.bf16.msra.mxu3 %v582_v6 }
   0xb   :  { %599 = vmatpush.bf16.msra.mxu1 %v574_v7 }
   0xc   :  { %603 = vmatpush.bf16.msra.mxu2 %v590_v8 }
   0xe   :  { %120 = vmatpush.bf16.msra.mxu0 %v581_v9  ;;  %596 = vmatpush.bf16.msra.mxu3 %v581_v9 }
   0xf   :  { %600 = vmatpush.bf16.msra.mxu1 %v573_v10 }
  0x10   :  { %604 = vmatpush.bf16.msra.mxu2 %v589_v11 }
  0x11   :  { %493 = vmatmul.msk.bf16.vlgmr.msra.gmra.mxu0 %vm100_vm0, %v577_v12  ;;  %494 = vmatmul.msk.bf16.vlgmr.msra.gmra.mxu3 %vm100_vm0, %v578_v13 }
  0x12   :  { %202 = vmatpush.bf16.msrb.mxu0 %v576_v1  ;;  %530 = vmatmul.msk.bf16.vlgmr.msra.gmra.mxu1 %vm100_vm0, %v570_v14 }
  0x13   :  { %566 = vmatmul.msk.bf16.vlgmr.msra.gmra.mxu2 %vm100_vm0, %v586_v15 }
  0x16   :  { %203 = vmatpush.bf16.msrb.mxu0 %v575_v4 }
  0x1a   :  { %204 = vmatpush.bf16.msrb.mxu0 %v574_v7 }
  0x1e   :  { %205 = vmatpush.bf16.msrb.mxu0 %v573_v10 }
  0x21   :  { %495 = vmatmul.msk.bf16.gmra.mxu3 %vm100_vm0, %v579_v16  ;;  %529 = vmatmul.msk.bf16.vlgmr.msrb.gmra.mxu0 %vm100_vm0, %v569_v17 }
  0x22   :  { %303 = vmatpush.bf16.msra.mxu0 %v592_v2  ;;  %531 = vmatmul.msk.bf16.gmra.mxu1 %vm100_vm0, %v571_v18 }
  0x23   :  { %567 = vmatmul.msk.bf16.gmra.mxu2 %vm100_vm0, %v587_v19 }
  0x26   :  { %304 = vmatpush.bf16.msra.mxu0 %v591_v5 }
  0x2a   :  { %305 = vmatpush.bf16.msra.mxu0 %v590_v8 }
  0x2e   :  { %306 = vmatpush.bf16.msra.mxu0 %v589_v11 }
  0x31   :  { %496 = vmatmul.msk.bf16.gmra.mxu3 %vm100_vm0, %v580_v20  ;;  %565 = vmatmul.msk.bf16.vlgmr.msra.gmra.mxu0 %vm100_vm0, %v585_v21 }
  0x32   :  { %532 = vmatmul.msk.bf16.gmra.mxu1 %vm100_vm0, %v572_v22 }
  0x33   :  { %568 = vmatmul.msk.bf16.gmra.mxu2 %vm100_vm0, %v588_v23 }
  0x8e   :  { %v122_v25 = vpop.f32.mrf.mxu0 }
  0x8f   :  { %v212_v26 = vpop.f32.mrf.mxu1 }
  0x94   :  { %v127_v27 = vpop.f32.mrf.mxu3 }
  0x95   :  { %v213_v28 = vadd.f32 %v212_v26, %v127_v27 }
  0x96   :  { %v313_v29 = vpop.f32.mrf.mxu2  ;;  %v124_v30 = vpop.f32.mrf.mxu0 }
  0x97   :  { %v745_v31 = vadd.f32 %v313_v29, %v213_v28  ;;  %v214_v32 = vpop.f32.mrf.mxu1 }
  0x99   :  { %vm338_vm1 = vcmp.gt.f32.partialorder %v745_v31, 0.0  ;;  %v346_v33 = vmul.f32 0.2, %v745_v31 }
  0x9b   :  { %v354_v34 = vsel %vm338_vm1, %v745_v31, %v346_v33 }
  0x9c   :  { %v129_v35 = vpop.f32.mrf.mxu3  ;;  %v362_v36 = vsub.f32 0.0, %v354_v34 }
  0x9d   :  { %v215_v37 = vadd.f32 %v214_v32, %v129_v35 }
  0x9e   :  { %v315_v38 = vpop.f32.mrf.mxu2  ;;  %v207_v39 = vpop.f32.mrf.mxu0  ;;  %v372_v40 = vmul.f32 1.442695, %v362_v36 }
  0x9f   :  { %v750_v41 = vadd.f32 %v315_v38, %v215_v37  ;;  %v217_v42 = vpop.f32.mrf.mxu1  ;;  %v208_v58 = vadd.f32 %v207_v39, %v122_v25 }
  0xa0   :  { %609 = vpow2.f32 %v372_v40 }
  0xa1   :  { %vm339_vm2 = vcmp.gt.f32.partialorder %v750_v41, 0.0  ;;  %v347_v43 = vmul.f32 0.2, %v750_v41 }
  0xa3   :  { %v355_v44 = vsel %vm339_vm2, %v750_v41, %v347_v43 }
  0xa4   :  { %v363_v45 = vsub.f32 0.0, %v355_v44  ;;  %v132_v46 = vpop.f32.mrf.mxu3 }
  0xa5   :  { %v218_v47 = vadd.f32 %v217_v42, %v132_v46 }
  0xa6   :  { %v318_v48 = vpop.f32.mrf.mxu2  ;;  %v755_v49 = vpop.eup %609  ;;  %v374_v50 = vmul.f32 1.442695, %v363_v45 }
  0xa7   :  { %v209_v51 = vpop.f32.mrf.mxu0  ;;  %v757_v52 = vadd.f32 %v318_v48, %v218_v47  ;;  %396 = vperm.xlu1 %606, %v755_v49   ;;  %v219_v53 = vpop.f32.mrf.mxu1 }
  0xa8   :  { %611 = vpow2.f32 %v374_v50  ;;  %v210_v10 = vadd.f32 %v209_v51, %v124_v30 }
  0xa9   :  { %vm340_vm3 = vcmp.gt.f32.partialorder %v757_v52, 0.0  ;;  %v348_v54 = vmul.f32 0.2, %v757_v52 }
  0xab   :  { %v356_v55 = vsel %vm340_vm3, %v757_v52, %v348_v54 }
  0xac   :  { %v134_v56 = vpop.f32.mrf.mxu3  ;;  %v364_v57 = vsub.f32 0.0, %v356_v55 }
  0xad   :  { %v220_v59 = vadd.f32 %v219_v53, %v134_v56 }
  0xae   :  { %v320_v60 = vpop.f32.mrf.mxu2  ;;  %v763_v61 = vpop.eup %611  ;;  %v376_v63 = vmul.f32 1.442695, %v364_v57 }
  0xaf   :  { %v308_v62 = vpop.f32.mrf.mxu0  ;;  %v765_v0 = vadd.f32 %v320_v60, %v220_v59  ;;  %401 = vperm.xlu1 %606, %v763_v61   ;;  %v222_v4 = vpop.f32.mrf.mxu1 }
  0xb0   :  { %v767_v1 = vadd.f32 %v308_v62, %v208_v58  ;;  %613 = vpow2.f32 %v376_v63 }
  0xb1   :  { %vm341_vm4 = vcmp.gt.f32.partialorder %v765_v0, 0.0  ;;  %v349_v2 = vmul.f32 0.2, %v765_v0 }
  0xb2   :  { %vm336_vm5 = vcmp.gt.f32.partialorder %v767_v1, 0.0  ;;  %v344_v3 = vmul.f32 0.2, %v767_v1 }
  0xb3   :  { %v357_v5 = vsel %vm341_vm4, %v765_v0, %v349_v2 }
  0xb4   :  { %v352_v6 = vsel %vm336_vm5, %v767_v1, %v344_v3  ;;  %v365_v7 = vsub.f32 0.0, %v357_v5  ;;  %v137_v8 = vpop.f32.mrf.mxu3 }
  0xb5   :  { %v360_v9 = vsub.f32 0.0, %v352_v6  ;;  %v223_v11 = vadd.f32 %v222_v4, %v137_v8 }
  0xb6   :  { %v323_v12 = vpop.f32.mrf.mxu2  ;;  %v614_v13 = vpop.eup %613  ;;  %v378_v14 = vmul.f32 1.442695, %v365_v7 }
  0xb7   :  { %v310_v15 = vpop.f32.mrf.mxu0  ;;  %v368_v16 = vmul.f32 1.442695, %v360_v9  ;;  %v776_v17 = vadd.f32 %v323_v12, %v223_v11  ;;  %406 = vperm.xlu2 %607, %v614_v13   ;;  %v224_v22 = vpop.f32.mrf.mxu1 }
  0xb8   :  { %v778_v18 = vadd.f32 %v310_v15, %v210_v10  ;;  %615 = vpow2.f32 %v378_v14 }
  0xb9   :  { %617 = vpow2.f32 %v368_v16  ;;  %v350_v20 = vmul.f32 0.2, %v776_v17  ;;  %vm342_vm7 = vcmp.gt.f32.partialorder %v776_v17, 0.0 }
  0xba   :  { %vm337_vm6 = vcmp.gt.f32.partialorder %v778_v18, 0.0  ;;  %v345_v19 = vmul.f32 0.2, %v778_v18 }
  0xbb   :  { %v358_v29 = vsel %vm342_vm7, %v776_v17, %v350_v20 }
  0xbc   :  { %v353_v21 = vsel %vm337_vm6, %v778_v18, %v345_v19  ;;  %v139_v24 = vpop.f32.mrf.mxu3  ;;  %v366_v34 = vsub.f32 0.0, %v358_v29 }
  0xbd   :  { %v361_v23 = vsub.f32 0.0, %v353_v21  ;;  %v225_v25 = vadd.f32 %v224_v22, %v139_v24 }
  0xbe   :  { %v616_v26 = vpop.eup %615  ;;  %v325_v28 = vpop.f32.mrf.mxu2  ;;  %v380_v37 = vmul.f32 1.442695, %v366_v34 }
  0xbf   :  { %v370_v27 = vmul.f32 1.442695, %v361_v23  ;;  %v335_v30 = vadd.f32 %v325_v28, %v225_v25  ;;  %411 = vperm.xlu2 %607, %v616_v26   ;;  %v618_v32 = vpop.eup %617 }
  0xc0   :  { %386 = vperm.xlu0 %608, %v618_v32  }
  0xc1   :  { %619 = vpow2.f32 %v370_v27  ;;  %vm343_vm8 = vcmp.gt.f32.partialorder %v335_v30, 0.0  ;;  %v351_v33 = vmul.f32 0.2, %v335_v30 }
  0xc3   :  { %v359_v35 = vsel %vm343_vm8, %v335_v30, %v351_v33 }
  0xc4   :  { %v367_v36 = vsub.f32 0.0, %v359_v35 }
  0xc6   :  { %v382_v38 = vmul.f32 1.442695, %v367_v36 }
  0xc7   :  { %v620_v39 = vpop.eup %619 }
  0xc8   :  { %621 = vpow2.f32 %v382_v38  ;;  %391 = vperm.xlu0 %608, %v620_v39  }
  0xc9   :  { %623 = vpow2.f32 %v380_v37 }
  0xce   :  { %v622_v40 = vpop.eup %621 }
  0xcf   :  { %421 = vperm.xlu1 %606, %v622_v40   ;;  %v624_v42 = vpop.eup %623 }
  0xd0   :  { %416 = vperm.xlu0 %608, %v624_v42  }
 0x111   :  { %v407_v43 = vpop.permute.xlu2 %406 }
 0x112   :  { %v428_v44 = vmul.f32 %v407_v43, %v757_v52 }
 0x114   :  { %v436_v45 = vsel %vm100_vm0, %v428_v44, %v614_v13 }
 0x115   :  { %v445_v46 = vsel %vm440_vm9, %v436_v45, 0.0 }
 0x116   :  { %453 = vst [vmem:[%s841_s6 + $0x20] sm:$0xff] %v445_v46 }
 0x119   :  { %v412_v47 = vpop.permute.xlu2 %411  ;;  %v397_v48 = vpop.permute.xlu1 %396 }
 0x11a   :  { %v429_v50 = vmul.f32 %v412_v47, %v765_v0  ;;  %v426_v51 = vmul.f32 %v397_v48, %v745_v31 }
 0x11c   :  { %v437_v53 = vsel %vm100_vm0, %v429_v50, %v616_v26  ;;  %v434_v54 = vsel %vm100_vm0, %v426_v51, %v755_v49 }
 0x11d   :  { %v446_v52 = vsel %vm440_vm9, %v437_v53, 0.0  ;;  %v443_v55 = vsel %vm440_vm9, %v434_v54, 0.0 }
 0x11e   :  { %454 = vst [vmem:[%s841_s6 + $0x28] sm:$0xff] %v446_v52 }
 0x11f   :  { %451 = vst [vmem:[%s841_s6 + $0x10] sm:$0xff] %v443_v55 }
 0x121   :  { %v402_v56 = vpop.permute.xlu1 %401 }
 0x122   :  { %v427_v31 = vmul.f32 %v402_v56, %v750_v41 }
 0x124   :  { %v435_v57 = vsel %vm100_vm0, %v427_v31, %v763_v61 }
 0x125   :  { %v444_v49 = vsel %vm440_vm9, %v435_v57, 0.0 }
 0x126   :  { %452 = vst [vmem:[%s841_s6 + $0x18] sm:$0xff] %v444_v49 }
 0x132   :  { %v387_v58 = vpop.permute.xlu0 %386 }
 0x133   :  { %v424_v59 = vmul.f32 %v387_v58, %v767_v1 }
 0x135   :  { %v432_v60 = vsel %vm100_vm0, %v424_v59, %v618_v32 }
 0x136   :  { %v441_v62 = vsel %vm440_vm9, %v432_v60, 0.0 }
 0x137   :  { %449 = vst [vmem:[%s841_s6] sm:$0xff] %v441_v62 }
 0x13a   :  { %v392_v41 = vpop.permute.xlu0 %391 }
 0x13b   :  { %v425_v61 = vmul.f32 %v392_v41, %v778_v18 }
 0x13d   :  { %v433_v63 = vsel %vm100_vm0, %v425_v61, %v620_v39 }
 0x13e   :  { %v442_v0 = vsel %vm440_vm9, %v433_v63, 0.0 }
 0x13f   :  { %450 = vst [vmem:[%s841_s6 + $0x8] sm:$0xff] %v442_v0 }
 0x141   :  { %v422_v1 = vpop.permute.xlu1 %421 }
 0x142   :  { %v431_v2 = vmul.f32 %v422_v1, %v335_v30  ;;  %v417_v3 = vpop.permute.xlu0 %416 }
 0x143   :  { %v430_v5 = vmul.f32 %v417_v3, %v776_v17 }
 0x144   :  { %v439_v4 = vsel %vm100_vm0, %v431_v2, %v622_v40 }
 0x145   :  { %v448_v6 = vsel %vm440_vm9, %v439_v4, 0.0  ;;  %v438_v7 = vsel %vm100_vm0, %v430_v5, %v624_v42 }
 0x146   :  { %456 = vst [vmem:[%s841_s6 + $0x38] sm:$0xff] %v448_v6  ;;  %v447_v8 = vsel %vm440_vm9, %v438_v7, 0.0 }
 0x147   :  { %455 = vst [vmem:[%s841_s6 + $0x30] sm:$0xff] %v447_v8 }

// kernel: spkbgat_forward.12
= control target key start
LH: loop header
LB: loop body
LE: loop exit
PB: predicated region body
PF: predicated region fallthrough
CT: control target
= control target key end

     0   :  { %s354_s1 = inlined_call_operand.vmem [shape: bf16[128,128], index: 1, kind: input, shape index: {}]   ;;  %s355_s0 = inlined_call_operand.vmem [shape: bf16[64,128], index: 0, kind: input, shape index: {}]   ;;  %s356_s2 = inlined_call_operand.vmem [shape: f32[64,128], index: 2, kind: output, shape index: {}]  }
   0x1   :  { %v254_v0 = vld [vmem:[%s354_s1 + $0x38] sm:$0xff]  ;;  %v253_v1 = vld [vmem:[%s354_s1 + $0x30] sm:$0xff]  ;;  %v252_v2 = vld [vmem:[%s354_s1 + $0x28] sm:$0xff] }
   0x2   :  { %127 = vmatpush.bf16.msra.mxu0 %v254_v0  ;;  %255 = vmatpush.bf16.msra.mxu1 %v254_v0  ;;  %v251_v3 = vld [vmem:[%s354_s1 + $0x20] sm:$0xff]  ;;  %v250_v4 = vld [vmem:[%s354_s1 + $0x18] sm:$0xff]  ;;  %v249_v5 = vld [vmem:[%s354_s1 + $0x10] sm:$0xff] }
   0x3   :  { %256 = vmatpush.bf16.msra.mxu2 %v254_v0  ;;  %257 = vmatpush.bf16.msra.mxu3 %v254_v0  ;;  %v248_v6 = vld [vmem:[%s354_s1 + $0x8] sm:$0xff]  ;;  %v247_v7 = vld [vmem:[%s354_s1] sm:$0xff]  ;;  %v245_v10 = vld [vmem:[%s355_s0 + $0x10] sm:$0xff] }
   0x4   :  { %v243_v8 = vld [vmem:[%s355_s0] sm:$0xff]  ;;  %v244_v9 = vld [vmem:[%s355_s0 + $0x8] sm:$0xff]  ;;  %v246_v11 = vld [vmem:[%s355_s0 + $0x18] sm:$0xff] }
   0x6   :  { %128 = vmatpush.bf16.msra.mxu0 %v253_v1  ;;  %258 = vmatpush.bf16.msra.mxu1 %v253_v1 }
   0x7   :  { %259 = vmatpush.bf16.msra.mxu2 %v253_v1  ;;  %260 = vmatpush.bf16.msra.mxu3 %v253_v1 }
   0xa   :  { %129 = vmatpush.bf16.msra.mxu0 %v252_v2  ;;  %261 = vmatpush.bf16.msra.mxu1 %v252_v2 }
   0xb   :  { %262 = vmatpush.bf16.msra.mxu2 %v252_v2  ;;  %263 = vmatpush.bf16.msra.mxu3 %v252_v2 }
   0xe   :  { %130 = vmatpush.bf16.msra.mxu0 %v251_v3  ;;  %264 = vmatpush.bf16.msra.mxu1 %v251_v3 }
   0xf   :  { %265 = vmatpush.bf16.msra.mxu2 %v251_v3  ;;  %266 = vmatpush.bf16.msra.mxu3 %v251_v3 }
  0x12   :  { %131 = vmatpush.bf16.msra.mxu0 %v250_v4  ;;  %267 = vmatpush.bf16.msra.mxu1 %v250_v4 }
  0x13   :  { %268 = vmatpush.bf16.msra.mxu2 %v250_v4  ;;  %269 = vmatpush.bf16.msra.mxu3 %v250_v4 }
  0x16   :  { %132 = vmatpush.bf16.msra.mxu0 %v249_v5  ;;  %270 = vmatpush.bf16.msra.mxu1 %v249_v5 }
  0x17   :  { %271 = vmatpush.bf16.msra.mxu2 %v249_v5  ;;  %272 = vmatpush.bf16.msra.mxu3 %v249_v5 }
  0x1a   :  { %133 = vmatpush.bf16.msra.mxu0 %v248_v6  ;;  %273 = vmatpush.bf16.msra.mxu1 %v248_v6 }
  0x1b   :  { %274 = vmatpush.bf16.msra.mxu2 %v248_v6  ;;  %275 = vmatpush.bf16.msra.mxu3 %v248_v6 }
  0x1e   :  { %134 = vmatpush.bf16.msra.mxu0 %v247_v7  ;;  %276 = vmatpush.bf16.msra.mxu1 %v247_v7 }
  0x1f   :  { %277 = vmatpush.bf16.msra.mxu2 %v247_v7  ;;  %278 = vmatpush.bf16.msra.mxu3 %v247_v7 }
  0x21   :  { %135 = vmatmul.bf16.vlgmr.msra.gmra.mxu0 %v243_v8  ;;  %140 = vmatmul.bf16.vlgmr.msra.gmra.mxu1 %v244_v9 }
  0x22   :  { %145 = vmatmul.bf16.vlgmr.msra.gmra.mxu2 %v245_v10  ;;  %150 = vmatmul.bf16.vlgmr.msra.gmra.mxu3 %v246_v11 }
  0x9e   :  { %v136_v12 = vpop.f32.mrf.mxu0  ;;  %v141_v13 = vpop.f32.mrf.mxu1 }
  0x9f   :  { %183 = vst [vmem:[%s356_s2] sm:$0xff] %v136_v12 }
  0xa0   :  { %185 = vst [vmem:[%s356_s2 + $0x10] sm:$0xff] %v141_v13 }
  0xa5   :  { %v146_v14 = vpop.f32.mrf.mxu2  ;;  %v151_v15 = vpop.f32.mrf.mxu3 }
  0xa6   :  { %187 = vst [vmem:[%s356_s2 + $0x20] sm:$0xff] %v146_v14  ;;  %v138_v16 = vpop.f32.mrf.mxu0  ;;  %v143_v17 = vpop.f32.mrf.mxu1 }
  0xa7   :  { %189 = vst [vmem:[%s356_s2 + $0x30] sm:$0xff] %v151_v15 }
  0xa8   :  { %184 = vst [vmem:[%s356_s2 + $0x8] sm:$0xff] %v138_v16 }
  0xa9   :  { %186 = vst [vmem:[%s356_s2 + $0x18] sm:$0xff] %v143_v17 }
  0xad   :  { %v148_v18 = vpop.f32.mrf.mxu2  ;;  %v153_v19 = vpop.f32.mrf.mxu3 }
  0xae   :  { %188 = vst [vmem:[%s356_s2 + $0x28] sm:$0xff] %v148_v18 }
  0xaf   :  { %190 = vst [vmem:[%s356_s2 + $0x38] sm:$0xff] %v153_v19 }

// kernel: spkbgat_forward.13
= control target key start
LH: loop header
LB: loop body
LE: loop exit
PB: predicated region body
PF: predicated region fallthrough
CT: control target
= control target key end

     0   :  { %v455_v3 = vmov 64   ;;  %s691_s0 = inlined_call_operand.vmem [shape: f32[64,128], index: 0, kind: input, shape index: {}]   ;;  %s692_s1 = inlined_call_operand.vmem [shape: f32[64,64], index: 1, kind: input, shape index: {}]   ;;  %s693_s2 = inlined_call_operand.vmem [shape: f32[64,1], index: 2, kind: input, shape index: {}]   ;;  %s694_s3 = inlined_call_operand.hbm [shape: f32[64,64], index: 3, kind: output, shape index: {}]  }
   0x1   :  { %v483_v0 = vld [vmem:[%s691_s0 + $0x20] sm:$0xff]  ;;  %v488_v1 = vld [vmem:[%s691_s0 + $0x10] sm:$0xff]  ;;  %377 = vset.pattern.permute.xlu2 %v455_v3  ;;  %376 = vset.pattern.permute.xlu1 %v455_v3  ;;  %v501_v4 = vld [vmem:[%s691_s0 + $0x28] sm:$0xff] }
   0x2   :  { %v493_v2 = vld [vmem:[%s691_s0] sm:$0xff]  ;;  %vm27_vm0 = vcmp.eq.f32.partialorder %v483_v0, 0.0  ;;  %vm25_vm1 = vcmp.eq.f32.partialorder %v488_v1, 0.0  ;;  %v506_v5 = vld [vmem:[%s691_s0 + $0x18] sm:$0xff]  ;;  %v511_v6 = vld [vmem:[%s691_s0 + $0x8] sm:$0xff]  ;;  %375 = vset.pattern.permute.xlu0 %v455_v3  ;;  %vm28_vm3 = vcmp.eq.f32.partialorder %v501_v4, 0.0 }
   0x3   :  { %vm23_vm2 = vcmp.eq.f32.partialorder %v493_v2, 0.0  ;;  %v35_v7 = vsel %vm27_vm0, 1e-12, %v483_v0  ;;  %v33_v8 = vsel %vm25_vm1, 1e-12, %v488_v1  ;;  %vm26_vm4 = vcmp.eq.f32.partialorder %v506_v5, 0.0 }
   0x4   :  { %v31_v9 = vsel %vm23_vm2, 1e-12, %v493_v2  ;;  %381 = vrcp.f32 %v35_v7  ;;  %vm24_vm5 = vcmp.eq.f32.partialorder %v511_v6, 0.0  ;;  %v36_v10 = vsel %vm28_vm3, 1e-12, %v501_v4 }
   0x5   :  { %383 = vrcp.f32 %v33_v8  ;;  %v34_v11 = vsel %vm26_vm4, 1e-12, %v506_v5 }
   0x6   :  { %385 = vrcp.f32 %v31_v9 }
   0x7   :  { %8 = vsyncpa [#allocation3], 0  ;;  %v32_v12 = vsel %vm24_vm5, 1e-12, %v511_v6  ;;  %387 = vrcp.f32 %v36_v10  ;;  %v525_v14 = vld [vmem:[%s691_s0 + $0x38] sm:$0xff]  ;;  %v530_v16 = vld [vmem:[%s691_s0 + $0x30] sm:$0xff] }
   0x8   :  { %389 = vrcp.f32 %v34_v11  ;;  %vm30_vm6 = vcmp.eq.f32.partialorder %v525_v14, 0.0  ;;  %vm29_vm7 = vcmp.eq.f32.partialorder %v530_v16, 0.0  ;;  %v143_v24 = vld [vmem:[%s693_s2] sm:$0xff]  ;;  %v456_v26 = vmov 0   ;;  %v146_v27 = vld [vmem:[%s693_s2 + $0x18] sm:$0xff]  ;;  %v145_v28 = vld [vmem:[%s693_s2 + $0x10] sm:$0xff] }
   0x9   :  { %391 = vrcp.f32 %v32_v12  ;;  %v38_v19 = vsel %vm30_vm6, 1e-12, %v525_v14  ;;  %v37_v21 = vsel %vm29_vm7, 1e-12, %v530_v16  ;;  %v144_v29 = vld [vmem:[%s693_s2 + $0x8] sm:$0xff]  ;;  %v147_v31 = vld [vmem:[%s693_s2 + $0x20] sm:$0xff] }
   0xa   :  { %v382_v13 = vpop.eup %381  ;;  %393 = vrcp.f32 %v38_v19  ;;  %v148_v30 = vld [vmem:[%s693_s2 + $0x28] sm:$0xff]  ;;  %v149_v32 = vld [vmem:[%s693_s2 + $0x30] sm:$0xff]  ;;  %v150_v33 = vld [vmem:[%s693_s2 + $0x38] sm:$0xff]  ;;  %vm215_vm10 = vcmask 523264   ;;  %s350_s6 = sshll.u32 %s694_s3, 4  ;;  %s458_s7 = smov 128   ;;  %s351_s6 = int_to_ptr.hbm [resolvable:$true] %s350_s6 }
   0xb   :  { %v384_v15 = vpop.eup %383  ;;  %69 = vperm.xlu2 %377, %v382_v13   ;;  %395 = vrcp.f32 %v37_v21  ;;  %v135_v56 = vld [vmem:[%s692_s1] sm:$0xff]  ;;  %v138_v11 = vld [vmem:[%s692_s1 + $0x18] sm:$0xff]  ;;  %s459_s8 = smov 8  }
   0xc   :  { %v386_v17 = vpop.eup %385  ;;  %59 = vperm.xlu1 %376, %v384_v15  }
   0xd   :  { %49 = vperm.xlu0 %375, %v386_v17   ;;  %v388_v18 = vpop.eup %387  ;;  %v137_v17 = vld [vmem:[%s692_s1 + $0x10] sm:$0xff] }
   0xe   :  { %v390_v20 = vpop.eup %389 }
   0xf   :  { %v392_v22 = vpop.eup %391 }
  0x10   :  { %v394_v23 = vpop.eup %393 }
  0x11   :  { %v396_v25 = vpop.eup %395 }
  0x13   :  { %74 = vperm.xlu2 %377, %v388_v18  }
  0x14   :  { %64 = vperm.xlu1 %376, %v390_v20  }
  0x15   :  { %54 = vperm.xlu0 %375, %v392_v22  }
  0x1b   :  { %378 = vset.pattern.permute.xlu2 %v456_v26 }
  0x1c   :  { %84 = vperm.xlu1 %376, %v394_v23   ;;  %153 = vperm.xlu2 %378, %v143_v24   ;;  %v136_v23 = vld [vmem:[%s692_s1 + $0x8] sm:$0xff] }
  0x1d   :  { %79 = vperm.xlu0 %375, %v396_v25  }
  0x24   :  { %380 = vset.pattern.permute.xlu1 %v456_v26  ;;  %168 = vperm.xlu2 %378, %v146_v27  }
  0x25   :  { %379 = vset.pattern.permute.xlu0 %v456_v26  ;;  %163 = vperm.xlu1 %380, %v145_v28  }
  0x26   :  { %158 = vperm.xlu0 %379, %v144_v29  }
  0x2c   :  { %178 = vperm.xlu2 %378, %v148_v30  }
  0x2d   :  { %173 = vperm.xlu1 %380, %v147_v31  }
  0x2e   :  { %183 = vperm.xlu0 %379, %v149_v32  }
  0x35   :  { %188 = vperm.xlu1 %380, %v150_v33  }
  0x65   :  { %v70_v34 = vpop.permute.xlu2 %69 }
  0x66   :  { %v568_v48 = vmul.f32 %v70_v34, %v483_v0  ;;  %v140_v34 = vld [vmem:[%s692_s1 + $0x28] sm:$0xff] }
  0x68   :  { %v111_v54 = vmul.f32 1.442695, %v568_v48  ;;  %vm99_vm14 = vcmp.gt.f32.partialorder %v568_v48, 0.0 }
  0x6d   :  { %v75_v35 = vpop.permute.xlu2 %74 }
  0x6e   :  { %v563_v42 = vmul.f32 %v75_v35, %v501_v4 }
  0x70   :  { %v113_v49 = vmul.f32 1.442695, %v563_v42  ;;  %vm100_vm12 = vcmp.gt.f32.partialorder %v563_v42, 0.0 }
  0x76   :  { %v154_v41 = vpop.permute.xlu2 %153 }
  0x7e   :  { %v60_v36 = vpop.permute.xlu1 %59  ;;  %v169_v58 = vpop.permute.xlu2 %168 }
  0x7f   :  { %v50_v37 = vpop.permute.xlu0 %49  ;;  %v89_v39 = vmul.f32 %v60_v36, %v488_v1 }
  0x80   :  { %v87_v38 = vmul.f32 %v50_v37, %v493_v2 }
  0x81   :  { %v107_v43 = vmul.f32 1.442695, %v89_v39  ;;  %vm97_vm11 = vcmp.gt.f32.partialorder %v89_v39, 0.0 }
  0x82   :  { %v103_v40 = vmul.f32 1.442695, %v87_v38  ;;  %vm95_vm8 = vcmp.gt.f32.partialorder %v87_v38, 0.0 }
  0x84   :  { %397 = vpow2.f32 %v103_v40 }
  0x85   :  { %399 = vpow2.f32 %v107_v43 }
  0x86   :  { %v65_v44 = vpop.permute.xlu1 %64  ;;  %v179_v20 = vpop.permute.xlu2 %178 }
  0x87   :  { %v90_v45 = vmul.f32 %v65_v44, %v506_v5  ;;  %v55_v46 = vpop.permute.xlu0 %54 }
  0x88   :  { %v88_v47 = vmul.f32 %v55_v46, %v511_v6 }
  0x89   :  { %v109_v50 = vmul.f32 1.442695, %v90_v45  ;;  %vm98_vm9 = vcmp.gt.f32.partialorder %v90_v45, 0.0 }
  0x8a   :  { %v398_v51 = vpop.eup %397  ;;  %v105_v52 = vmul.f32 1.442695, %v88_v47  ;;  %vm96_vm13 = vcmp.gt.f32.partialorder %v88_v47, 0.0 }
  0x8b   :  { %v362_v53 = vadd.f32 -1.0, %v398_v51  ;;  %401 = vpow2.f32 %v109_v50  ;;  %v400_v61 = vpop.eup %399 }
  0x8c   :  { %403 = vpow2.f32 %v105_v52  ;;  %v364_v7 = vadd.f32 -1.0, %v400_v61 }
  0x8d   :  { %405 = vpow2.f32 %v113_v49  ;;  %v127_v55 = vsel %vm95_vm8, %v87_v38, %v362_v53 }
  0x8e   :  { %v191_v57 = vmul.f32 %v154_v41, %v127_v55  ;;  %v85_v59 = vpop.permute.xlu1 %84  ;;  %407 = vpow2.f32 %v111_v54  ;;  %v139_v41 = vld [vmem:[%s692_s1 + $0x20] sm:$0xff] }
  0x8f   :  { %v80_v60 = vpop.permute.xlu0 %79  ;;  %v581_v3 = vmul.f32 %v85_v59, %v525_v14 }
  0x90   :  { %v576_v62 = vmul.f32 %v80_v60, %v530_v16  ;;  %v578_v63 = vadd.f32 %v191_v57, %v135_v56  ;;  %v129_v16 = vsel %vm97_vm11, %v89_v39, %v364_v7 }
  0x91   :  { %v402_v0 = vpop.eup %401  ;;  %v117_v14 = vmul.f32 1.442695, %v581_v3  ;;  %vm102_vm0 = vcmp.gt.f32.partialorder %v581_v3, 0.0 }
  0x92   :  { %v404_v1 = vpop.eup %403  ;;  %v365_v2 = vadd.f32 -1.0, %v402_v0  ;;  %v115_v4 = vmul.f32 1.442695, %v576_v62  ;;  %v207_v5 = vmul.f32 %v578_v63, %v578_v63  ;;  %vm101_vm15 = vcmp.gt.f32.partialorder %v576_v62, 0.0 }
  0x93   :  { %v406_v6 = vpop.eup %405  ;;  %v363_v10 = vadd.f32 -1.0, %v404_v1 }
  0x94   :  { %v130_v8 = vsel %vm98_vm9, %v90_v45, %v365_v2  ;;  %409 = vpow2.f32 %v115_v4  ;;  %v216_v9 = vsel %vm215_vm10, %v207_v5, 0.0  ;;  %v367_v13 = vadd.f32 -1.0, %v406_v6  ;;  %v408_v15 = vpop.eup %407 }
  0x95   :  { %v194_v12 = vmul.f32 %v169_v58, %v130_v8  ;;  %217 = vadd.xlane.f32.xlu2 %v216_v9  ;;  %v128_v22 = vsel %vm96_vm13, %v88_v47, %v363_v10  ;;  %411 = vpow2.f32 %v117_v14  ;;  %v366_v33 = vadd.f32 -1.0, %v408_v15  ;;  %v141_v47 = vld [vmem:[%s692_s1 + $0x30] sm:$0xff]  ;;  %v142_v58 = vld [vmem:[%s692_s1 + $0x38] sm:$0xff]  ;;  %s457_s1 = smov [#allocation2]  }
  0x96   :  { %v132_v28 = vsel %vm100_vm12, %v563_v42, %v367_v13  ;;  %s348_s30 = sshll.u32 %s457_s1, 4  ;;  %s349_s30 = int_to_ptr.vmem [resolvable:$true] %s348_s30 }
  0x97   :  { %v164_v18 = vpop.permute.xlu1 %163  ;;  %v595_v19 = vadd.f32 %v194_v12, %v138_v11  ;;  %v196_v30 = vmul.f32 %v179_v20, %v132_v28  ;;  %v131_v40 = vsel %vm99_vm14, %v568_v48, %v366_v33 }
  0x98   :  { %v193_v21 = vmul.f32 %v164_v18, %v129_v16  ;;  %v159_v24 = vpop.permute.xlu0 %158 }
  0x99   :  { %v192_v25 = vmul.f32 %v159_v24, %v128_v22  ;;  %v210_v26 = vmul.f32 %v595_v19, %v595_v19  ;;  %v617_v39 = vadd.f32 %v196_v30, %v140_v34 }
  0x9a   :  { %v410_v27 = vpop.eup %409  ;;  %v603_v29 = vadd.f32 %v193_v21, %v137_v17 }
  0x9b   :  { %v605_v31 = vadd.f32 %v192_v25, %v136_v23  ;;  %v225_v32 = vsel %vm215_vm10, %v210_v26, 0.0  ;;  %v368_v36 = vadd.f32 -1.0, %v410_v27  ;;  %v412_v44 = vpop.eup %411  ;;  %v212_v53 = vmul.f32 %v617_v39, %v617_v39 }
  0x9c   :  { %v209_v35 = vmul.f32 %v603_v29, %v603_v29  ;;  %v369_v52 = vadd.f32 -1.0, %v412_v44 }
  0x9d   :  { %226 = vadd.xlane.f32.xlu2 %v225_v32  ;;  %v208_v37 = vmul.f32 %v605_v31, %v605_v31  ;;  %v133_v46 = vsel %vm101_vm15, %v576_v62, %v368_v36  ;;  %v231_v60 = vsel %vm215_vm10, %v212_v53, 0.0 }
  0x9e   :  { %v222_v38 = vsel %vm215_vm10, %v209_v35, 0.0  ;;  %v134_v57 = vsel %vm102_vm0, %v581_v3, %v369_v52 }
  0x9f   :  { %223 = vadd.xlane.f32.xlu1 %v222_v38  ;;  %v174_v42 = vpop.permute.xlu1 %173  ;;  %v219_v43 = vsel %vm215_vm10, %v208_v37, 0.0 }
  0xa0   :  { %v195_v45 = vmul.f32 %v174_v42, %v131_v40  ;;  %220 = vadd.xlane.f32.xlu0 %v219_v43  ;;  %v184_v49 = vpop.permute.xlu0 %183 }
  0xa1   :  { %v197_v48 = vmul.f32 %v184_v49, %v133_v46 }
  0xa2   :  { %v629_v50 = vadd.f32 %v195_v45, %v139_v41 }
  0xa3   :  { %v631_v51 = vadd.f32 %v197_v48, %v141_v47 }
  0xa4   :  { %v211_v54 = vmul.f32 %v629_v50, %v629_v50 }
  0xa5   :  { %v213_v55 = vmul.f32 %v631_v51, %v631_v51 }
  0xa6   :  { %v228_v56 = vsel %vm215_vm10, %v211_v54, 0.0 }
  0xa7   :  { %v189_v59 = vpop.permute.xlu1 %188  ;;  %229 = vadd.xlane.f32.xlu2 %v228_v56  ;;  %v234_v61 = vsel %vm215_vm10, %v213_v55, 0.0 }
  0xa8   :  { %v198_v62 = vmul.f32 %v189_v59, %v134_v57  ;;  %232 = vadd.xlane.f32.xlu0 %v231_v60  ;;  %235 = vadd.xlane.f32.xlu1 %v234_v61 }
  0xaa   :  { %v647_v0 = vadd.f32 %v198_v62, %v142_v58 }
  0xac   :  { %v214_v1 = vmul.f32 %v647_v0, %v647_v0 }
  0xae   :  { %v237_v2 = vsel %vm215_vm10, %v214_v1, 0.0 }
  0xaf   :  { %238 = vadd.xlane.f32.xlu2 %v237_v2 }
 0x108   :  { %v218_v3 = vpop.xlane.xlu2 %217 }
 0x109   :  { %v240_v4 = vmax.f32 %v218_v3, 1e-24 }
 0x10b   :  { %413 = vrsqrt.f32 %v240_v4  ;;  %vm254_vm2 = vweird.f32 %v240_v4 }
 0x110   :  { %v227_v5 = vpop.xlane.xlu2 %226 }
 0x111   :  { %v414_v6 = vpop.eup %413  ;;  %v243_v7 = vmax.f32 %v227_v5, 1e-24 }
 0x112   :  { %v249_v8 = vmul.f32 %v414_v6, %v240_v4  ;;  %v224_v9 = vpop.xlane.xlu1 %223  ;;  %vm255_vm1 = vweird.f32 %v414_v6 }
 0x113   :  { %415 = vrsqrt.f32 %v243_v7  ;;  %v242_v10 = vmax.f32 %v224_v9, 1e-24  ;;  %v221_v11 = vpop.xlane.xlu0 %220  ;;  %vm256_vm3 = vmor %vm254_vm2, %vm255_vm1  ;;  %vm284_vm5 = vweird.f32 %v243_v7 }
 0x114   :  { %v250_v12 = vmul.f32 %v414_v6, %v249_v8  ;;  %v241_v13 = vmax.f32 %v221_v11, 1e-24 }
 0x115   :  { %417 = vrsqrt.f32 %v242_v10  ;;  %vm274_vm9 = vweird.f32 %v242_v10 }
 0x116   :  { %v251_v14 = vmul.f32 0.5, %v250_v12  ;;  %419 = vrsqrt.f32 %v241_v13  ;;  %vm264_vm12 = vweird.f32 %v241_v13 }
 0x118   :  { %v252_v15 = vsub.f32 1.5, %v251_v14 }
 0x119   :  { %v416_v16 = vpop.eup %415 }
 0x11a   :  { %v253_v17 = vmul.f32 %v414_v6, %v252_v15  ;;  %v279_v18 = vmul.f32 %v416_v16, %v243_v7  ;;  %v230_v20 = vpop.xlane.xlu2 %229  ;;  %vm285_vm4 = vweird.f32 %v416_v16 }
 0x11b   :  { %v418_v21 = vpop.eup %417  ;;  %v652_v22 = vmax.f32 %v230_v20, 1e-24  ;;  %v236_v23 = vpop.xlane.xlu1 %235  ;;  %vm286_vm7 = vmor %vm284_vm5, %vm285_vm4 }
 0x11c   :  { %v420_v24 = vpop.eup %419  ;;  %v257_v25 = vsel %vm256_vm3, %v414_v6, %v253_v17  ;;  %v280_v26 = vmul.f32 %v416_v16, %v279_v18  ;;  %v269_v27 = vmul.f32 %v418_v21, %v242_v10  ;;  %v233_v28 = vpop.xlane.xlu0 %232  ;;  %v656_v35 = vmax.f32 %v236_v23, 1e-24 }
 0x11d   :  { %v328_v30 = vmul.f32 %v257_v25, %v578_v63  ;;  %v259_v32 = vmul.f32 %v420_v24, %v241_v13  ;;  %421 = vrsqrt.f32 %v652_v22  ;;  %v659_v37 = vmax.f32 %v233_v28, 1e-24 }
 0x11e   :  { %v281_v33 = vmul.f32 0.5, %v280_v26  ;;  %v270_v34 = vmul.f32 %v418_v21, %v269_v27  ;;  %423 = vrsqrt.f32 %v656_v35  ;;  %vm275_vm6 = vweird.f32 %v418_v21 }
 0x11f   :  { %336 = vst.msk [vmem:[#allocation2] sm:$0xff] %vm215_vm10, %v328_v30  ;;  %v260_v36 = vmul.f32 %v420_v24, %v259_v32  ;;  %425 = vrsqrt.f32 %v659_v37  ;;  %vm265_vm8 = vweird.f32 %v420_v24  ;;  %vm276_vm11 = vmor %vm274_vm9, %vm275_vm6  ;;  %vm294_vm15 = vweird.f32 %v652_v22 }
 0x120   :  { %v282_v38 = vsub.f32 1.5, %v281_v33  ;;  %v271_v40 = vmul.f32 0.5, %v270_v34  ;;  %vm266_vm13 = vmor %vm264_vm12, %vm265_vm8  ;;  %vm314_vm3 = vweird.f32 %v656_v35  ;;  %vm304_vm5 = vweird.f32 %v659_v37 }
 0x121   :  { %v261_v41 = vmul.f32 0.5, %v260_v36 }
 0x122   :  { %v283_v63 = vmul.f32 %v416_v16, %v282_v38  ;;  %v272_v42 = vsub.f32 1.5, %v271_v40  ;;  %v239_v43 = vpop.xlane.xlu2 %238 }
 0x123   :  { %v422_v44 = vpop.eup %421  ;;  %v262_v45 = vsub.f32 1.5, %v261_v41  ;;  %v663_v46 = vmax.f32 %v239_v43, 1e-24 }
 0x124   :  { %v287_v47 = vsel %vm286_vm7, %v416_v16, %v283_v63  ;;  %v273_v49 = vmul.f32 %v418_v21, %v272_v42  ;;  %v289_v48 = vmul.f32 %v422_v44, %v652_v22  ;;  %v424_v54 = vpop.eup %423  ;;  %vm295_vm14 = vweird.f32 %v422_v44 }
 0x125   :  { %v331_v52 = vmul.f32 %v287_v47, %v595_v19  ;;  %v263_v53 = vmul.f32 %v420_v24, %v262_v45  ;;  %427 = vrsqrt.f32 %v663_v46  ;;  %v426_v57 = vpop.eup %425  ;;  %v309_v60 = vmul.f32 %v424_v54, %v656_v35  ;;  %vm296_vm0 = vmor %vm294_vm15, %vm295_vm14 }
 0x126   :  { %v277_v55 = vsel %vm276_vm11, %v418_v21, %v273_v49  ;;  %v290_v56 = vmul.f32 %v422_v44, %v289_v48  ;;  %v299_v62 = vmul.f32 %v426_v57, %v659_v37  ;;  %vm315_vm1 = vweird.f32 %v424_v54 }
 0x127   :  { %339 = vst.msk [vmem:[#allocation2 + $0x18] sm:$0xff] %vm215_vm10, %v331_v52  ;;  %v330_v58 = vmul.f32 %v277_v55, %v603_v29  ;;  %v267_v59 = vsel %vm266_vm13, %v420_v24, %v263_v53  ;;  %v310_v1 = vmul.f32 %v424_v54, %v309_v60  ;;  %vm305_vm2 = vweird.f32 %v426_v57  ;;  %vm316_vm4 = vmor %vm314_vm3, %vm315_vm1 }
 0x128   :  { %v329_v61 = vmul.f32 %v267_v59, %v605_v31  ;;  %v291_v19 = vmul.f32 0.5, %v290_v56  ;;  %v300_v3 = vmul.f32 %v426_v57, %v299_v62  ;;  %vm306_vm6 = vmor %vm304_vm5, %vm305_vm2  ;;  %vm324_vm8 = vweird.f32 %v663_v46 }
 0x129   :  { %338 = vst.msk [vmem:[#allocation2 + $0x10] sm:$0xff] %vm215_vm10, %v330_v58  ;;  %v311_v5 = vmul.f32 0.5, %v310_v1 }
 0x12a   :  { %337 = vst.msk [vmem:[#allocation2 + $0x8] sm:$0xff] %vm215_vm10, %v329_v61  ;;  %v292_v2 = vsub.f32 1.5, %v291_v19  ;;  %v301_v29 = vmul.f32 0.5, %v300_v3 }
 0x12b   :  { %v428_v4 = vpop.eup %427  ;;  %v312_v31 = vsub.f32 1.5, %v311_v5 }
 0x12c   :  { %v293_v6 = vmul.f32 %v422_v44, %v292_v2  ;;  %v319_v7 = vmul.f32 %v428_v4, %v663_v46  ;;  %v302_v9 = vsub.f32 1.5, %v301_v29  ;;  %vm325_vm7 = vweird.f32 %v428_v4 }
 0x12d   :  { %v313_v12 = vmul.f32 %v424_v54, %v312_v31  ;;  %vm326_vm9 = vmor %vm324_vm8, %vm325_vm7 }
 0x12e   :  { %v297_v8 = vsel %vm296_vm0, %v422_v44, %v293_v6  ;;  %v320_v10 = vmul.f32 %v428_v4, %v319_v7  ;;  %v303_v13 = vmul.f32 %v426_v57, %v302_v9 }
 0x12f   :  { %v332_v11 = vmul.f32 %v297_v8, %v629_v50  ;;  %v317_v15 = vsel %vm316_vm4, %v424_v54, %v313_v12 }
 0x130   :  { %v321_v14 = vmul.f32 0.5, %v320_v10  ;;  %v334_v16 = vmul.f32 %v317_v15, %v631_v51  ;;  %v307_v17 = vsel %vm306_vm6, %v426_v57, %v303_v13 }
 0x131   :  { %340 = vst.msk [vmem:[#allocation2 + $0x20] sm:$0xff] %vm215_vm10, %v332_v11  ;;  %v333_v20 = vmul.f32 %v307_v17, %v617_v39 }
 0x132   :  { %v322_v18 = vsub.f32 1.5, %v321_v14  ;;  %342 = vst.msk [vmem:[#allocation2 + $0x30] sm:$0xff] %vm215_vm10, %v334_v16 }
 0x133   :  { %341 = vst.msk [vmem:[#allocation2 + $0x28] sm:$0xff] %vm215_vm10, %v333_v20 }
 0x134   :  { %v323_v50 = vmul.f32 %v428_v4, %v322_v18 }
 0x136   :  { %v327_v51 = vsel %vm326_vm9, %v428_v4, %v323_v50 }
 0x137   :  { %v335_v21 = vmul.f32 %v327_v51, %v647_v0 }
 0x139   :  { %343 = vst.msk [vmem:[#allocation2 + $0x38] sm:$0xff] %vm215_vm10, %v335_v21 }
 0x13a   :  { %356 = dma.vmem_to_hbm [thread:$0]  %s349_s30, 1024, %s351_s6, [#allocation3], %s458_s7, %s458_s7, %s459_s8  }
 0x13b   :  { %453 = dma.done.wait [#allocation3], 1024  }
 0x13c   :  { %454 = vsyncadd [#allocation3], 4294966272 }
 0x13d   :  { %361 = vsyncpa [#allocation3], 1 }

</bundles_post_ra>
